<compile_context>
chip_gen: v7x
topology: tpu7x:2x2x1
jax: 0.10.0
libtpu: 0.0.40
codegen_flags: <defaults>
</compile_context>

<pallas_src>
import jax
import jax.numpy as jnp
from jax.experimental import pallas as pl
from jax.experimental.pallas import tpu as pltpu

HIDDEN = 768          # BERT hidden size (fc1 output, fc2 input)
PREP = 53             # prep_features dim  (fc1 input = 768 + 53)
PREP_PAD = 64         # prep K padded 53 -> 64 (bf16 sublane tile), zero rows -> math identical
FC2_OUT = 2           # fc2 output classes
N_PAD = 128           # fc2 output zero-padded 2 -> 128 (lane-dense store)
VOCAB = 32            # toy vocab for the embedding stand-in
SEQ = 8               # toy sequence length


def _round_up(x, m):
    return ((x + m - 1) // m) * m


def _default_tm_max():
    """MXU-matched batch-tile cap: 128 on <=v5 (128-high MXU), 256 on v6e/v7x."""
    try:
        kind = jax.devices()[0].device_kind.lower()
    except Exception:
        return 256
    if any(v in kind for v in ("v2", "v3", "v4", "v5")):
        return 128
    return 256


def head_kernel(x1_ref, x2_ref, w1a_ref, w1b_ref, b1_ref, w2_ref, b2_ref, o_ref):
    # x1:  (TM, 768) bf16 CLS block        (pipelined per grid step)
    # x2:  (TM, 64)  bf16 prep block (cols 53.. zero)
    # W1a: (768, 768) bf16                 -- VMEM-resident, single-buffered
    # W1b: (64, 768)  bf16 (rows 53.. zero)
    # W2 : (768, 128) bf16 (cols 2.. zero)
    # b1:  (1, 768) f32, b2: (1, 128) f32
    h = jnp.dot(x1_ref[...], w1a_ref[...], preferred_element_type=jnp.float32)
    h = h + jnp.dot(x2_ref[...], w1b_ref[...], preferred_element_type=jnp.float32)
    h = jnp.maximum(h + b1_ref[...], 0.0)        # ReLU; dropout == identity at inference
    out = jnp.dot(h.astype(jnp.bfloat16), w2_ref[...],
                  preferred_element_type=jnp.float32)
    o_ref[...] = out + b2_ref[...]               # f32, lane-dense (TM, 128) store


def prepare_head_params(w1, b1, w2, b2):
    """One-time (model-init) weight prep: split/pad W1, pad W2, cast to bf16.

    Hoisted out of the per-call path so per-inference calls never touch the f32
    weights.  Zero padding keeps the math identical to fc1/fc2 of the PyTorch model.
    """
    w1 = jnp.asarray(w1, jnp.float32)            # (821, 768)
    w1a = w1[:HIDDEN, :].astype(jnp.bfloat16)    # (768, 768)
    w1b = jnp.zeros((PREP_PAD, HIDDEN), jnp.bfloat16)
    w1b = w1b.at[:PREP, :].set(w1[HIDDEN:, :].astype(jnp.bfloat16))   # (64, 768)
    b1r = jnp.asarray(b1, jnp.float32).reshape(1, HIDDEN)
    w2p = jnp.zeros((HIDDEN, N_PAD), jnp.bfloat16)
    w2p = w2p.at[:, :FC2_OUT].set(jnp.asarray(w2).astype(jnp.bfloat16))
    b2r = jnp.zeros((1, N_PAD), jnp.float32)
    b2r = b2r.at[:, :FC2_OUT].set(jnp.asarray(b2, jnp.float32))
    return {"w1a": w1a, "w1b": w1b, "b1": b1r, "w2": w2p, "b2": b2r}


def mymodel_head(x1, x2, params, *, tm_max=None):
    """relu(cat(x1, x2) @ W1 + b1) @ W2 + b2   (dropout = identity at inference).

    x1: (B, 768) f32 CLS embeddings; x2: (B, 53) f32 prep features.
    params: output of prepare_head_params (pre-padded bf16 weights, f32 biases).
    Returns (B, 2) f32 logits.
    """
    B = x1.shape[0]
    if tm_max is None:
        tm_max = _default_tm_max()

    # Batch tile: multiple of 16 (bf16 sublane packing), capped by the MXU-matched
    # tm_max, sized to minimize batch-padding waste (e.g. B=130 -> tm=144, not 256).
    n_tiles = pl.cdiv(B, tm_max)
    tm = _round_up(pl.cdiv(B, n_tiles), 16)
    grid_len = pl.cdiv(B, tm)
    B_pad = grid_len * tm

    # Per-call activation prep only (tiny: ~B*831*2 bytes).  No concatenated 896-wide
    # slab is materialized in HBM; x1/x2 stay separate and fc1 is split into two dots.
    x1p = jnp.zeros((B_pad, HIDDEN), jnp.bfloat16).at[:B, :].set(x1.astype(jnp.bfloat16))
    x2p = jnp.zeros((B_pad, PREP_PAD), jnp.bfloat16).at[:B, :PREP].set(x2.astype(jnp.bfloat16))

    # Megacore: only shard the batch axis across TensorCores when per-core compute
    # amortizes the duplicated ~1.4 MiB weight DMA (weight-DMA-bound for small B).
    batch_sem = "parallel" if grid_len >= 4 else "arbitrary"

    # Untiled VMEM residency for weights/biases: fetched once, single-buffered.
    resident = pl.BlockSpec(memory_space=pltpu.MemorySpace.VMEM)

    out_padded = pl.pallas_call(
        head_kernel,
        out_shape=jax.ShapeDtypeStruct((B_pad, N_PAD), jnp.float32),
        grid_spec=pltpu.PrefetchScalarGridSpec(
            num_scalar_prefetch=0,
            grid=(grid_len,),
            in_specs=[
                pl.BlockSpec((tm, HIDDEN), lambda i: (i, 0)),     # x1 tile (pipelined)
                pl.BlockSpec((tm, PREP_PAD), lambda i: (i, 0)),   # x2 tile (pipelined)
                resident,   # W1a
                resident,   # W1b
                resident,   # b1
                resident,   # W2
                resident,   # b2
            ],
            out_specs=pl.BlockSpec((tm, N_PAD), lambda i: (i, 0)),
        ),
        compiler_params=pltpu.CompilerParams(
            dimension_semantics=(batch_sem,),
            vmem_limit_bytes=32 * 1024 * 1024,     # explicit; actual need is ~3 MiB
        ),
    )(x1p, x2p, params["w1a"], params["w1b"], params["b1"], params["w2"], params["b2"])

    return out_padded[:B, :FC2_OUT]


def bert_cls_standin(embed_table, input_ids, attention_mask):
    # TODO(synk): full BERT encoder (self-attention stack) is not reproduced; this is a
    # deterministic embedding-lookup stand-in producing last_hidden_state[:, 0, :].
    # In production the head above should be fused into the last encoder layer's kernel
    # (or W1/W2 kept VMEM-resident across calls via cross-call prefetch) so the CLS
    # vector and head weights never round-trip through HBM per inference.
    del attention_mask  # unused by the stand-in
    hidden = embed_table[input_ids]          # (B, S, 768)
    return hidden[:, 0, :]                   # CLS token embedding (B, 768)


if __name__ == "__main__":
    key = jax.random.PRNGKey(0)
    k_emb, k_w1, k_b1, k_w2, k_b2, k_ids, k_prep = jax.random.split(key, 7)

    B = 2

    # Deterministic "parameters"
    embed_table = jax.random.normal(k_emb, (VOCAB, HIDDEN), jnp.float32) * 0.02
    w1 = jax.random.normal(k_w1, (HIDDEN + PREP, HIDDEN), jnp.float32) * (1.0 / jnp.sqrt(HIDDEN + PREP))
    b1 = jax.random.normal(k_b1, (HIDDEN,), jnp.float32) * 0.01
    w2 = jax.random.normal(k_w2, (HIDDEN, FC2_OUT), jnp.float32) * (1.0 / jnp.sqrt(HIDDEN))
    b2 = jax.random.normal(k_b2, (FC2_OUT,), jnp.float32) * 0.01

    # One-time weight prep (model init) -- NOT in the per-call path.
    head_params = jax.tree_util.tree_map(jax.block_until_ready,
                                         prepare_head_params(w1, b1, w2, b2))

    # Inputs
    input_ids = jax.random.randint(k_ids, (B, SEQ), 0, VOCAB, jnp.int32)
    attention_mask = jnp.ones((B, SEQ), jnp.int32)
    prep_features = jax.random.normal(k_prep, (B, PREP), jnp.float32)

    # Forward: bert (stand-in) -> Pallas head kernel
    x1 = bert_cls_standin(embed_table, input_ids, attention_mask)
    out = mymodel_head(x1, prep_features, head_params)
    out = jax.block_until_ready(out)
    assert out.shape == (B, FC2_OUT)

    # Reference in plain JAX using the same bf16 quantization / f32 accumulation.
    x1q = x1.astype(jnp.bfloat16)
    x2q = prep_features.astype(jnp.bfloat16)
    w1q = w1.astype(jnp.bfloat16)
    w2q = w2.astype(jnp.bfloat16)
    x_cat = jnp.concatenate([x1q, x2q], axis=1)
    h_ref = jnp.maximum(
        jnp.dot(x_cat, w1q, preferred_element_type=jnp.float32) + b1, 0.0)
    ref = jnp.dot(h_ref.astype(jnp.bfloat16), w2q,
                  preferred_element_type=jnp.float32) + b2
    assert jnp.allclose(out, ref, atol=1e-2, rtol=1e-2), (out, ref)

    print("KERNEL_OK")
</pallas_src>

<mosaic_0001>
module attributes {stable_mosaic.version = 11 : i64} {
  func.func @head_kernel(%arg0: i32, %arg1: memref<16x768xbf16, #tpu.memory_space<vmem>>, %arg2: memref<16x64xbf16, #tpu.memory_space<vmem>>, %arg3: memref<768x768xbf16, #tpu.memory_space<vmem>>, %arg4: memref<64x768xbf16, #tpu.memory_space<vmem>>, %arg5: memref<1x768xf32, #tpu.memory_space<vmem>>, %arg6: memref<768x128xbf16, #tpu.memory_space<vmem>>, %arg7: memref<1x128xf32, #tpu.memory_space<vmem>>, %arg8: memref<16x128xf32, #tpu.memory_space<vmem>>) attributes {dimension_semantics = [#tpu.dimension_semantics<arbitrary>], iteration_bounds = array<i64: 1>, scalar_prefetch = 0 : i64, scratch_operands = 0 : i64, tpu.core_type = #tpu.core_type<tc>, window_params = [{transform_indices = @transform_0, window_bounds = array<i64: 16, 768>}, {transform_indices = @transform_1, window_bounds = array<i64: 16, 64>}, {pipeline_mode = #tpu.pipeline_mode<synchronous>, transform_indices = @transform_2, window_bounds = array<i64: 768, 768>}, {pipeline_mode = #tpu.pipeline_mode<synchronous>, transform_indices = @transform_3, window_bounds = array<i64: 64, 768>}, {pipeline_mode = #tpu.pipeline_mode<synchronous>, transform_indices = @transform_4, window_bounds = array<i64: 1, 768>}, {pipeline_mode = #tpu.pipeline_mode<synchronous>, transform_indices = @transform_5, window_bounds = array<i64: 768, 128>}, {pipeline_mode = #tpu.pipeline_mode<synchronous>, transform_indices = @transform_6, window_bounds = array<i64: 1, 128>}, {transform_indices = @transform_7, window_bounds = array<i64: 16, 128>}]} {
    %c0 = arith.constant 0 : index
    %c0_0 = arith.constant 0 : index
    %0 = vector.load %arg1[%c0, %c0_0] : memref<16x768xbf16, #tpu.memory_space<vmem>>, vector<16x768xbf16>
    %c0_1 = arith.constant 0 : index
    %c0_2 = arith.constant 0 : index
    %1 = vector.load %arg3[%c0_1, %c0_2] : memref<768x768xbf16, #tpu.memory_space<vmem>>, vector<768x768xbf16>
    %cst = arith.constant dense<0.000000e+00> : vector<16x768xf32>
    %2 = tpu.matmul %0, %1, %cst {dimension_numbers = #tpu.dot_dimension_numbers<[1], [0], [0], [1], [0, 0, 1, 1], [], []>} : vector<16x768xbf16>, vector<768x768xbf16>, vector<16x768xf32> -> vector<16x768xf32>
    %c0_3 = arith.constant 0 : index
    %c0_4 = arith.constant 0 : index
    %3 = vector.load %arg2[%c0_3, %c0_4] : memref<16x64xbf16, #tpu.memory_space<vmem>>, vector<16x64xbf16>
    %c0_5 = arith.constant 0 : index
    %c0_6 = arith.constant 0 : index
    %4 = vector.load %arg4[%c0_5, %c0_6] : memref<64x768xbf16, #tpu.memory_space<vmem>>, vector<64x768xbf16>
    %cst_7 = arith.constant dense<0.000000e+00> : vector<16x768xf32>
    %5 = tpu.matmul %3, %4, %cst_7 {dimension_numbers = #tpu.dot_dimension_numbers<[1], [0], [0], [1], [0, 0, 1, 1], [], []>} : vector<16x64xbf16>, vector<64x768xbf16>, vector<16x768xf32> -> vector<16x768xf32>
    %6 = arith.addf %2, %5 : vector<16x768xf32>
    %c0_8 = arith.constant 0 : index
    %c0_9 = arith.constant 0 : index
    %7 = vector.load %arg5[%c0_8, %c0_9] : memref<1x768xf32, #tpu.memory_space<vmem>>, vector<1x768xf32>
    %8 = vector.broadcast %7 : vector<1x768xf32> to vector<16x768xf32>
    %9 = arith.addf %6, %8 : vector<16x768xf32>
    %cst_10 = arith.constant 0.000000e+00 : f32
    %10 = vector.broadcast %cst_10 : f32 to vector<16x768xf32>
    %11 = arith.maximumf %9, %10 : vector<16x768xf32>
    %12 = arith.truncf %11 : vector<16x768xf32> to vector<16x768xbf16>
    %c0_11 = arith.constant 0 : index
    %c0_12 = arith.constant 0 : index
    %13 = vector.load %arg6[%c0_11, %c0_12] : memref<768x128xbf16, #tpu.memory_space<vmem>>, vector<768x128xbf16>
    %cst_13 = arith.constant dense<0.000000e+00> : vector<16x128xf32>
    %14 = tpu.matmul %12, %13, %cst_13 {dimension_numbers = #tpu.dot_dimension_numbers<[1], [0], [0], [1], [0, 0, 1, 1], [], []>} : vector<16x768xbf16>, vector<768x128xbf16>, vector<16x128xf32> -> vector<16x128xf32>
    %c0_14 = arith.constant 0 : index
    %c0_15 = arith.constant 0 : index
    %15 = vector.load %arg7[%c0_14, %c0_15] : memref<1x128xf32, #tpu.memory_space<vmem>>, vector<1x128xf32>
    %16 = vector.broadcast %15 : vector<1x128xf32> to vector<16x128xf32>
    %17 = arith.addf %14, %16 : vector<16x128xf32>
    %c0_16 = arith.constant 0 : index
    %c0_17 = arith.constant 0 : index
    %18 = vector.load %arg8[%c0_16, %c0_17] : memref<16x128xf32, #tpu.memory_space<vmem>>, vector<16x128xf32>
    tpu.vector_store %arg8[%c0_16, %c0_17], %17 {strides = array<i32>} : memref<16x128xf32, #tpu.memory_space<vmem>>, vector<16x128xf32>,
    return
  }
  func.func @transform_0(%arg0: i32) -> (i32, i32) {
    %c0_i32 = arith.constant 0 : i32
    %c0_i32_0 = arith.constant 0 : i32
    return %arg0, %c0_i32 : i32, i32
  }
  func.func @transform_1(%arg0: i32) -> (i32, i32) {
    %c0_i32 = arith.constant 0 : i32
    %c0_i32_0 = arith.constant 0 : i32
    return %arg0, %c0_i32 : i32, i32
  }
  func.func @transform_2(%arg0: i32) -> (i32, i32) {
    %c0_i32 = arith.constant 0 : i32
    %c0_i32_0 = arith.constant 0 : i32
    %c0_i32_1 = arith.constant 0 : i32
    return %c0_i32, %c0_i32_0 : i32, i32
  }
  func.func @transform_3(%arg0: i32) -> (i32, i32) {
    %c0_i32 = arith.constant 0 : i32
    %c0_i32_0 = arith.constant 0 : i32
    %c0_i32_1 = arith.constant 0 : i32
    return %c0_i32, %c0_i32_0 : i32, i32
  }
  func.func @transform_4(%arg0: i32) -> (i32, i32) {
    %c0_i32 = arith.constant 0 : i32
    %c0_i32_0 = arith.constant 0 : i32
    %c0_i32_1 = arith.constant 0 : i32
    return %c0_i32, %c0_i32_0 : i32, i32
  }
  func.func @transform_5(%arg0: i32) -> (i32, i32) {
    %c0_i32 = arith.constant 0 : i32
    %c0_i32_0 = arith.constant 0 : i32
    %c0_i32_1 = arith.constant 0 : i32
    return %c0_i32, %c0_i32_0 : i32, i32
  }
  func.func @transform_6(%arg0: i32) -> (i32, i32) {
    %c0_i32 = arith.constant 0 : i32
    %c0_i32_0 = arith.constant 0 : i32
    %c0_i32_1 = arith.constant 0 : i32
    return %c0_i32, %c0_i32_0 : i32, i32
  }
  func.func @transform_7(%arg0: i32) -> (i32, i32) {
    %c0_i32 = arith.constant 0 : i32
    %c0_i32_0 = arith.constant 0 : i32
    return %arg0, %c0_i32 : i32, i32
  }
}

</mosaic_0001>

<bundles_post_ra>
// kernel: tpu_custom_call.1
= control target key start
LH: loop header
LB: loop body
LE: loop exit
PB: predicated region body
PF: predicated region fallthrough
CT: control target
= control target key end

     0   :  { %12 = vsyncpa [#allocation3], 0  ;;  %s4591_s0 = inlined_call_operand.hbm [shape: bf16[16,768], index: 0, kind: input, shape index: {}]   ;;  %s4592_s1 = inlined_call_operand.hbm [shape: bf16[16,64], index: 1, kind: input, shape index: {}]   ;;  %s4593_s2 = inlined_call_operand.hbm [shape: bf16[768,768], index: 2, kind: input, shape index: {}]   ;;  %s4594_s3 = inlined_call_operand.hbm [shape: bf16[64,768], index: 3, kind: input, shape index: {}]   ;;  %s4595_s4 = inlined_call_operand.hbm [shape: f32[1,768], index: 4, kind: input, shape index: {}]   ;;  %s4596_s5 = inlined_call_operand.hbm [shape: bf16[768,128], index: 5, kind: input, shape index: {}]   ;;  %s4597_s6 = inlined_call_operand.hbm [shape: f32[1,128], index: 6, kind: input, shape index: {}]   ;;  %s4598_s7 = inlined_call_operand.hbm [shape: f32[16,128], index: 7, kind: output, shape index: {}]  }
   0x1   :  { %13 = vsyncpa [#allocation6], 0 }
   0x2   :  { %14 = vsyncpa [#allocation9], 0 }
   0x3   :  { %15 = vsyncpa [#allocation12], 0 }
   0x4   :  { %16 = vsyncpa [#allocation4], 0  ;;  %s4357_s24 = smov [#allocation5]   ;;  %s4171_s28 = scalar_lea.hbm %s4592_s1, 128 }
   0x5   :  { %s34_s25 = sshll.u32 %s4357_s24, 4  ;;  %p4172_p0 = scmp.ne.s32.totalorder %s4592_s1, %s4171_s28  ;;  %s35_s25 = int_to_ptr.vmem [resolvable:$true] %s34_s25 }
   0x6   :  { %p4175_p1 = scmp.lt.u32.totalorder %s4171_s28, %s4592_s1 }
   0x8   :  { %p4177_p2 = pnand %p4175_p1, %p4172_p0 }
   0xa   :  { %4180 = shalt.err (!%p4177_p2)
}
   0xb   :  { %s4181_s10 = scalar_lea.vmem %s35_s25, 128  ;;  %p4186_p4 = scmp.lt.s32.totalorder %s35_s25, %s35_s25 }
   0xc   :  { %p4182_p3 = scmp.ne.s32.totalorder %s35_s25, %s4181_s10  ;;  %p4187_p5 = scmp.lt.s32.totalorder %s4181_s10, %s4181_s10 }
   0xe   :  { %p4188_p6 = por %p4187_p5, %p4186_p4 }
  0x10   :  { %p4189_p7 = pnand %p4188_p6, %p4182_p3 }
  0x12   :  { %4192 = shalt.err (!%p4189_p7)
}
  0x13   :  { %s4358_s11 = smov 64   ;;  %s4359_s12 = smov 4  }
  0x14   :  { %40 = dma.hbm_to_vmem [thread:$0]  %s4592_s1, 128, %s35_s25, [#allocation6], %s4358_s11, %s4358_s11, %s4359_s12  }
  0x15   :  { %s4360_s15 = smov [#allocation8]   ;;  %s4361_s17 = smov [#allocation11]  }
  0x16   :  { %s58_s16 = sshll.u32 %s4360_s15, 4  ;;  %s80_s18 = sshll.u32 %s4361_s17, 4  ;;  %s59_s16 = int_to_ptr.vmem [resolvable:$true] %s58_s16  ;;  %s81_s18 = int_to_ptr.vmem [resolvable:$true] %s80_s18 }
  0x17   :  { %s4193_s21 = scalar_lea.hbm %s4594_s3, 3072 }
  0x18   :  { %p4194_p8 = scmp.ne.s32.totalorder %s4594_s3, %s4193_s21  ;;  %p4197_p9 = scmp.lt.u32.totalorder %s4193_s21, %s4594_s3 }
  0x1a   :  { %p4199_p10 = pnand %p4197_p9, %p4194_p8 }
  0x1c   :  { %4202 = shalt.err (!%p4199_p10)
}
  0x1d   :  { %s4203_s1 = scalar_lea.vmem %s59_s16, 3072  ;;  %p4208_p12 = scmp.lt.s32.totalorder %s59_s16, %s59_s16 }
  0x1e   :  { %p4204_p11 = scmp.ne.s32.totalorder %s59_s16, %s4203_s1  ;;  %p4209_p13 = scmp.lt.s32.totalorder %s4203_s1, %s4203_s1 }
  0x20   :  { %p4210_p0 = por %p4209_p13, %p4208_p12 }
  0x22   :  { %p4211_p1 = pnand %p4210_p0, %p4204_p11 }
  0x24   :  { %4214 = shalt.err (!%p4211_p1)
}
  0x25   :  { %s4362_s25 = smov 384   ;;  %s4363_s27 = smov 24  }
  0x26   :  { %64 = dma.hbm_to_vmem [thread:$0]  %s4594_s3, 3072, %s59_s16, [#allocation9], %s4362_s25, %s4362_s25, %s4363_s27  }
  0x27   :  { %s4215_s9 = scalar_lea.hbm %s4596_s5, 6144 }
  0x28   :  { %p4216_p2 = scmp.ne.s32.totalorder %s4596_s5, %s4215_s9  ;;  %p4219_p3 = scmp.lt.u32.totalorder %s4215_s9, %s4596_s5 }
  0x2a   :  { %p4221_p4 = pnand %p4219_p3, %p4216_p2 }
  0x2c   :  { %4224 = shalt.err (!%p4221_p4)
}
  0x2d   :  { %s4225_s17 = scalar_lea.vmem %s81_s18, 6144  ;;  %p4230_p6 = scmp.lt.s32.totalorder %s81_s18, %s81_s18 }
  0x2e   :  { %p4226_p5 = scmp.ne.s32.totalorder %s81_s18, %s4225_s17  ;;  %p4231_p7 = scmp.lt.s32.totalorder %s4225_s17, %s4225_s17 }
  0x30   :  { %p4232_p8 = por %p4231_p7, %p4230_p6 }
  0x32   :  { %p4233_p9 = pnand %p4232_p8, %p4226_p5 }
  0x34   :  { %4236 = shalt.err (!%p4233_p9)
}
  0x35   :  { %86 = dma.hbm_to_vmem [thread:$0]  %s4596_s5, 6144, %s81_s18, [#allocation12], %s4358_s11, %s4358_s11, %s4359_s12  }
  0x36   :  { %s4364_s19 = smov [#allocation2]   ;;  %s4365_s21 = smov [#allocation7]  }
  0x37   :  { %s22_s20 = sshll.u32 %s4364_s19, 4  ;;  %s46_s22 = sshll.u32 %s4365_s21, 4  ;;  %s23_s20 = int_to_ptr.vmem [resolvable:$true] %s22_s20  ;;  %s47_s22 = int_to_ptr.vmem [resolvable:$true] %s46_s22 }
  0x38   :  { %s4237_s26 = scalar_lea.hbm %s4591_s0, 768 }
  0x39   :  { %p4238_p10 = scmp.ne.s32.totalorder %s4591_s0, %s4237_s26  ;;  %p4241_p11 = scmp.lt.u32.totalorder %s4237_s26, %s4591_s0 }
  0x3b   :  { %p4243_p12 = pnand %p4241_p11, %p4238_p10 }
  0x3d   :  { %4246 = shalt.err (!%p4243_p12)
}
  0x3e   :  { %s4247_s5 = scalar_lea.vmem %s23_s20, 768  ;;  %p4252_p0 = scmp.lt.s32.totalorder %s23_s20, %s23_s20 }
  0x3f   :  { %p4248_p13 = scmp.ne.s32.totalorder %s23_s20, %s4247_s5  ;;  %p4253_p1 = scmp.lt.s32.totalorder %s4247_s5, %s4247_s5 }
  0x41   :  { %p4254_p2 = por %p4253_p1, %p4252_p0 }
  0x43   :  { %p4255_p3 = pnand %p4254_p2, %p4248_p13 }
  0x45   :  { %4258 = shalt.err (!%p4255_p3)
}
  0x46   :  { %28 = dma.hbm_to_vmem [thread:$0]  %s4591_s0, 768, %s23_s20, [#allocation3], %s4362_s25, %s4362_s25, %s4363_s27  }
  0x47   :  { %s4259_s9 = scalar_lea.hbm %s4593_s2, 36864 }
  0x48   :  { %p4260_p4 = scmp.ne.s32.totalorder %s4593_s2, %s4259_s9  ;;  %p4263_p5 = scmp.lt.u32.totalorder %s4259_s9, %s4593_s2 }
  0x4a   :  { %p4265_p6 = pnand %p4263_p5, %p4260_p4 }
  0x4c   :  { %4268 = shalt.err (!%p4265_p6)
}
  0x4d   :  { %s4269_s17 = scalar_lea.vmem %s47_s22, 36864  ;;  %p4274_p8 = scmp.lt.s32.totalorder %s47_s22, %s47_s22 }
  0x4e   :  { %p4270_p7 = scmp.ne.s32.totalorder %s47_s22, %s4269_s17  ;;  %p4275_p9 = scmp.lt.s32.totalorder %s4269_s17, %s4269_s17 }
  0x50   :  { %p4276_p10 = por %p4275_p9, %p4274_p8 }
  0x52   :  { %p4277_p11 = pnand %p4276_p10, %p4270_p7 }
  0x54   :  { %4280 = shalt.err (!%p4277_p11)
}
  0x55   :  { %52 = dma.hbm_to_vmem [thread:$0]  %s4593_s2, 36864, %s47_s22, [#allocation6], %s4362_s25, %s4362_s25, %s4363_s27  }
  0x56   :  { %s4366_s16 = smov [#allocation10]   ;;  %s4367_s20 = smov [#allocation13]  }
  0x57   :  { %s71_s19 = sshll.u32 %s4366_s16, 4  ;;  %s93_s21 = sshll.u32 %s4367_s20, 4  ;;  %s72_s19 = int_to_ptr.vmem [resolvable:$true] %s71_s19  ;;  %s94_s21 = int_to_ptr.vmem [resolvable:$true] %s93_s21 }
  0x58   :  { %s4281_s26 = scalar_lea.hbm %s4595_s4, 96 }
  0x59   :  { %p4282_p12 = scmp.ne.s32.totalorder %s4595_s4, %s4281_s26  ;;  %p4285_p13 = scmp.lt.u32.totalorder %s4281_s26, %s4595_s4 }
  0x5b   :  { %p4287_p0 = pnand %p4285_p13, %p4282_p12 }
  0x5d   :  { %4290 = shalt.err (!%p4287_p0)
}
  0x5e   :  { %s4291_s2 = scalar_lea.vmem %s72_s19, 96  ;;  %p4296_p2 = scmp.lt.s32.totalorder %s72_s19, %s72_s19 }
  0x5f   :  { %p4292_p1 = scmp.ne.s32.totalorder %s72_s19, %s4291_s2  ;;  %p4297_p3 = scmp.lt.s32.totalorder %s4291_s2, %s4291_s2 }
  0x61   :  { %p4298_p4 = por %p4297_p3, %p4296_p2 }
  0x63   :  { %p4299_p5 = pnand %p4298_p4, %p4292_p1 }
  0x65   :  { %4302 = shalt.err (!%p4299_p5)
}
  0x66   :  { %74 = dma.hbm_to_vmem [thread:$0]  %s4595_s4, 96, %s72_s19, [#allocation9]  }
  0x67   :  { %s4303_s11 = scalar_lea.hbm %s4597_s6, 16 }
  0x68   :  { %p4304_p6 = scmp.ne.s32.totalorder %s4597_s6, %s4303_s11  ;;  %p4307_p7 = scmp.lt.u32.totalorder %s4303_s11, %s4597_s6 }
  0x6a   :  { %p4309_p8 = pnand %p4307_p7, %p4304_p6 }
  0x6c   :  { %4312 = shalt.err (!%p4309_p8)
}
  0x6d   :  { %s4313_s10 = scalar_lea.vmem %s94_s21, 16  ;;  %s4317_s13 = scalar_lea.vmem %s94_s21, 32 }
  0x6e   :  { %p4314_p9 = scmp.ne.s32.totalorder %s94_s21, %s4313_s10  ;;  %p4318_p10 = scmp.lt.s32.totalorder %s94_s21, %s94_s21 }
  0x6f   :  { %p4319_p11 = scmp.lt.s32.totalorder %s4317_s13, %s4313_s10 }
  0x71   :  { %p4320_p12 = por %p4319_p11, %p4318_p10 }
  0x73   :  { %p4321_p13 = pnand %p4320_p12, %p4314_p9 }
  0x75   :  { %4324 = shalt.err (!%p4321_p13)
}
  0x76   :  { %96 = dma.hbm_to_vmem [thread:$0]  %s4597_s6, 16, %s94_s21, [#allocation12]  }
  0x77   :  { %4347 = dma.done.wait [#allocation3], 768  }
  0x78   :  { %4348 = vsyncadd [#allocation3], 4294966528 }
  0x79   :  { %4349 = dma.done.wait [#allocation6], 36992  }
  0x7a   :  { %4350 = vsyncadd [#allocation6], 4294930304 }
  0x7b   :  { %4351 = dma.done.wait [#allocation9], 3168  }
  0x7c   :  { %4352 = vsyncadd [#allocation9], 4294964128 }
  0x7d   :  { %4353 = dma.done.wait [#allocation12], 6160  }
  0x7e   :  { %4354 = vsyncadd [#allocation12], 4294961136  ;;  %v4368_v0 = vmov 0   ;;  %v3640_v1 = vld [vmem:[#allocation8 + $0x4] ss:$24 sps:$4 sm:$0xff]   ;;  %vm564_vm0 = vcmask 523264  }
  0x7f   :  { %600 = vmatprep.mubr.bf16.mxu0 %v4368_v0  ;;  %643 = vmatprep.mubr.bf16.mxu1 %v4368_v0  ;;  %v3642_v2 = vld [vmem:[#allocation8 + $0xc] ss:$24 sps:$4 sm:$0xff]   ;;  %v3644_v3 = vld [vmem:[#allocation8] ss:$24 sps:$4 sm:$0xff]   ;;  %v3648_v6 = vld [vmem:[#allocation8 + $0x3c] ss:$24 sps:$4 sm:$0xff]  }
  0x80   :  { %568 = vmatprep.subr.bf16.mxu0 %v3640_v1  ;;  %v3645_v4 = vld [vmem:[#allocation8 + $0x8] ss:$24 sps:$4 sm:$0xff]   ;;  %611 = vmatprep.subr.bf16.mxu1 %v3642_v2  ;;  %v3646_v5 = vld [vmem:[#allocation8 + $0x34] ss:$24 sps:$4 sm:$0xff]   ;;  %v3651_v8 = vld [vmem:[#allocation8 + $0x38] ss:$24 sps:$4 sm:$0xff]  }
  0x81   :  { %569 = vmatpush1.bf16.msra.mxu0 %v3644_v3  ;;  %612 = vmatpush1.bf16.msra.mxu1 %v3645_v4  ;;  %v3650_v7 = vld [vmem:[#allocation8 + $0x30] ss:$24 sps:$4 sm:$0xff]   ;;  %v3652_v9 = vld [vmem:[#allocation8 + $0x64] ss:$24 sps:$4 sm:$0xff]   ;;  %v3656_v11 = vld [vmem:[#allocation8 + $0x60] ss:$24 sps:$4 sm:$0xff]  }
  0x82   :  { %570 = vmatprep.subr.bf16.mxu0 %v3646_v5  ;;  %613 = vmatprep.subr.bf16.mxu1 %v3648_v6  ;;  %v3654_v10 = vld [vmem:[#allocation8 + $0x6c] ss:$24 sps:$4 sm:$0xff]   ;;  %v3657_v12 = vld [vmem:[#allocation8 + $0x68] ss:$24 sps:$4 sm:$0xff]   ;;  %v3660_v14 = vld [vmem:[#allocation8 + $0x9c] ss:$24 sps:$4 sm:$0xff]  }
  0x83   :  { %v3658_v13 = vld [vmem:[#allocation8 + $0x94] ss:$24 sps:$4 sm:$0xff]   ;;  %v3662_v15 = vld [vmem:[#allocation8 + $0x90] ss:$24 sps:$4 sm:$0xff]   ;;  %v3670_v18 = vld [vmem:[#allocation7 + $0x4] ss:$24 sps:$4 sm:$0xff]  }
  0x84   :  { %v3663_v16 = vld [vmem:[#allocation8 + $0x98] ss:$24 sps:$4 sm:$0xff]   ;;  %v3667_v17 = vld [vmem:[#allocation8 + $0x14] ss:$24 sps:$4 sm:$0xff]   ;;  %v3673_v22 = vld [vmem:[#allocation8 + $0x44] ss:$24 sps:$4 sm:$0xff]  }
  0x85   :  { %571 = vmatpush1.bf16.msra.mxu0 %v3650_v7  ;;  %614 = vmatpush1.bf16.msra.mxu1 %v3651_v8  ;;  %v3664_v19 = vld [vmem:[#allocation5] sm:$0xff]   ;;  %v3665_v20 = vld [vmem:[#allocation8 + $0x10] ss:$24 sps:$4 sm:$0xff]   ;;  %v3676_v23 = vld [vmem:[#allocation7 + $0x34] ss:$24 sps:$4 sm:$0xff]   ;;  %s4369_s6 = smov [#allocation14]  }
  0x86   :  { %572 = vmatprep.subr.bf16.mxu0 %v3652_v9  ;;  %615 = vmatprep.subr.bf16.mxu1 %v3654_v10  ;;  %v3668_v21 = vld [vmem:[#allocation7] ss:$24 sps:$4 sm:$0xff]   ;;  %v3674_v25 = vld [vmem:[#allocation7 + $0x30] ss:$24 sps:$4 sm:$0xff]   ;;  %v3679_v26 = vld [vmem:[#allocation8 + $0x74] ss:$24 sps:$4 sm:$0xff]  }
  0x87   :  { %v3671_v24 = vld [vmem:[#allocation8 + $0x40] ss:$24 sps:$4 sm:$0xff]   ;;  %v3682_v27 = vld [vmem:[#allocation7 + $0x64] ss:$24 sps:$4 sm:$0xff]   ;;  %v3677_v28 = vld [vmem:[#allocation8 + $0x70] ss:$24 sps:$4 sm:$0xff]  }
  0x88   :  { %v3680_v29 = vld [vmem:[#allocation7 + $0x60] ss:$24 sps:$4 sm:$0xff]   ;;  %v3685_v30 = vld [vmem:[#allocation8 + $0xa4] ss:$24 sps:$4 sm:$0xff]   ;;  %v3688_v31 = vld [vmem:[#allocation7 + $0x94] ss:$24 sps:$4 sm:$0xff]  }
  0x89   :  { %573 = vmatpush1.bf16.msra.mxu0 %v3656_v11  ;;  %616 = vmatpush1.bf16.msra.mxu1 %v3657_v12  ;;  %v3683_v32 = vld [vmem:[#allocation8 + $0xa0] ss:$24 sps:$4 sm:$0xff]   ;;  %v3686_v33 = vld [vmem:[#allocation7 + $0x90] ss:$24 sps:$4 sm:$0xff]   ;;  %v3691_v34 = vld [vmem:[#allocation7 + $0xc4] ss:$24 sps:$4 sm:$0xff]  }
  0x8a   :  { %574 = vmatprep.subr.bf16.mxu0 %v3658_v13  ;;  %617 = vmatprep.subr.bf16.mxu1 %v3660_v14  ;;  %v3694_v35 = vld [vmem:[#allocation7 + $0x304] ss:$24 sps:$4 sm:$0xff]   ;;  %v3689_v36 = vld [vmem:[#allocation7 + $0xc0] ss:$24 sps:$4 sm:$0xff]   ;;  %v3697_v38 = vld [vmem:[#allocation7 + $0xf4] ss:$24 sps:$4 sm:$0xff]  }
  0x8b   :  { %v3692_v37 = vld [vmem:[#allocation7 + $0x300] ss:$24 sps:$4 sm:$0xff]   ;;  %v3700_v39 = vld [vmem:[#allocation7 + $0x334] ss:$24 sps:$4 sm:$0xff]   ;;  %v3695_v40 = vld [vmem:[#allocation7 + $0xf0] ss:$24 sps:$4 sm:$0xff]  }
  0x8c   :  { %v3698_v41 = vld [vmem:[#allocation7 + $0x330] ss:$24 sps:$4 sm:$0xff]   ;;  %v3703_v42 = vld [vmem:[#allocation7 + $0x124] ss:$24 sps:$4 sm:$0xff]   ;;  %v3701_v44 = vld [vmem:[#allocation7 + $0x120] ss:$24 sps:$4 sm:$0xff]  }
  0x8d   :  { %575 = vmatpush1.bf16.msra.mxu0 %v3662_v15  ;;  %618 = vmatpush1.bf16.msra.mxu1 %v3663_v16  ;;  %v3706_v43 = vld [vmem:[#allocation7 + $0x364] ss:$24 sps:$4 sm:$0xff]   ;;  %v3704_v45 = vld [vmem:[#allocation7 + $0x360] ss:$24 sps:$4 sm:$0xff]   ;;  %v3709_v46 = vld [vmem:[#allocation7 + $0x154] ss:$24 sps:$4 sm:$0xff]  }
  0x8e   :  { %654 = vmatprep.subr.bf16.mxu0 %v3667_v17  ;;  %2167 = vmatprep.subr.bf16.mxu1 %v3670_v18  ;;  %v3712_v47 = vld [vmem:[#allocation7 + $0x394] ss:$24 sps:$4 sm:$0xff]   ;;  %v3707_v48 = vld [vmem:[#allocation7 + $0x150] ss:$24 sps:$4 sm:$0xff]   ;;  %v3715_v50 = vld [vmem:[#allocation7 + $0x184] ss:$24 sps:$4 sm:$0xff]  }
  0x8f   :  { %v3710_v49 = vld [vmem:[#allocation7 + $0x390] ss:$24 sps:$4 sm:$0xff]   ;;  %v3718_v51 = vld [vmem:[#allocation7 + $0x3c4] ss:$24 sps:$4 sm:$0xff]   ;;  %v3713_v52 = vld [vmem:[#allocation7 + $0x180] ss:$24 sps:$4 sm:$0xff]  }
  0x90   :  { %3177 = vmatmul.mubr.msk.bf16.vlgmr.msra.gmra.mrb[0].mxu0 %vm564_vm0, %v3664_v19  ;;  %3178 = vmatmul.mubr.msk.bf16.vlgmr.msra.gmra.mrb[0].mxu1 %vm564_vm0, %v3664_v19  ;;  %v3716_v53 = vld [vmem:[#allocation7 + $0x3c0] ss:$24 sps:$4 sm:$0xff]   ;;  %v3721_v54 = vld [vmem:[#allocation7 + $0x1b4] ss:$24 sps:$4 sm:$0xff]   ;;  %v3719_v56 = vld [vmem:[#allocation7 + $0x1b0] ss:$24 sps:$4 sm:$0xff]  }
  0x91   :  { %655 = vmatpush1.bf16.msra.mxu0 %v3665_v20  ;;  %2168 = vmatpush1.bf16.msra.mxu1 %v3668_v21  ;;  %v3724_v55 = vld [vmem:[#allocation7 + $0x3f4] ss:$24 sps:$4 sm:$0xff]   ;;  %v3722_v57 = vld [vmem:[#allocation7 + $0x3f0] ss:$24 sps:$4 sm:$0xff]   ;;  %v3727_v58 = vld [vmem:[#allocation7 + $0x1e4] ss:$24 sps:$4 sm:$0xff]  }
  0x92   :  { %656 = vmatprep.subr.bf16.mxu0 %v3673_v22  ;;  %2169 = vmatprep.subr.bf16.mxu1 %v3676_v23  ;;  %v3730_v59 = vld [vmem:[#allocation7 + $0x424] ss:$24 sps:$4 sm:$0xff]   ;;  %v3725_v60 = vld [vmem:[#allocation7 + $0x1e0] ss:$24 sps:$4 sm:$0xff]   ;;  %v3733_v63 = vld [vmem:[#allocation7 + $0x214] ss:$24 sps:$4 sm:$0xff]  }
  0x93   :  { %686 = vmatprep.mubr.bf16.mxu0 %v4368_v0  ;;  %v4514_v61 = vld [vmem:[#allocation2 + $0x4] ss:$24 sps:$4 sm:$0xff]   ;;  %v3728_v62 = vld [vmem:[#allocation7 + $0x420] ss:$24 sps:$4 sm:$0xff]   ;;  %v3731_v1 = vld [vmem:[#allocation7 + $0x210] ss:$24 sps:$4 sm:$0xff]  }
  0x94   :  { %v3736_v0 = vld [vmem:[#allocation7 + $0x454] ss:$24 sps:$4 sm:$0xff]   ;;  %2199 = vmatprep.mubr.bf16.mxu1 %v4514_v61  ;;  %v3734_v2 = vld [vmem:[#allocation7 + $0x450] ss:$24 sps:$4 sm:$0xff]   ;;  %v3739_v3 = vld [vmem:[#allocation7 + $0x244] ss:$24 sps:$4 sm:$0xff]  }
  0x95   :  { %657 = vmatpush1.bf16.msra.mxu0 %v3671_v24  ;;  %2170 = vmatpush1.bf16.msra.mxu1 %v3674_v25  ;;  %v3742_v4 = vld [vmem:[#allocation7 + $0x484] ss:$24 sps:$4 sm:$0xff]   ;;  %v3737_v5 = vld [vmem:[#allocation7 + $0x240] ss:$24 sps:$4 sm:$0xff]   ;;  %v3745_v7 = vld [vmem:[#allocation7 + $0x274] ss:$24 sps:$4 sm:$0xff]  }
  0x96   :  { %658 = vmatprep.subr.bf16.mxu0 %v3679_v26  ;;  %2171 = vmatprep.subr.bf16.mxu1 %v3682_v27  ;;  %v3740_v6 = vld [vmem:[#allocation7 + $0x480] ss:$24 sps:$4 sm:$0xff]   ;;  %v3748_v8 = vld [vmem:[#allocation7 + $0x4b4] ss:$24 sps:$4 sm:$0xff]   ;;  %v3743_v9 = vld [vmem:[#allocation7 + $0x270] ss:$24 sps:$4 sm:$0xff]  }
  0x97   :  { %v4517_v10 = vld [vmem:[#allocation2 + $0xc] ss:$24 sps:$4 sm:$0xff]   ;;  %v3746_v11 = vld [vmem:[#allocation7 + $0x4b0] ss:$24 sps:$4 sm:$0xff]   ;;  %v3751_v12 = vld [vmem:[#allocation7 + $0x2a4] ss:$24 sps:$4 sm:$0xff]  }
  0x98   :  { %v3754_v13 = vld [vmem:[#allocation7 + $0x4e4] ss:$24 sps:$4 sm:$0xff]   ;;  %v3749_v14 = vld [vmem:[#allocation7 + $0x2a0] ss:$24 sps:$4 sm:$0xff]   ;;  %v3757_v16 = vld [vmem:[#allocation7 + $0x2d4] ss:$24 sps:$4 sm:$0xff]  }
  0x99   :  { %659 = vmatpush1.bf16.msra.mxu0 %v3677_v28  ;;  %2172 = vmatpush1.bf16.msra.mxu1 %v3680_v29  ;;  %v3752_v15 = vld [vmem:[#allocation7 + $0x4e0] ss:$24 sps:$4 sm:$0xff]   ;;  %v3760_v17 = vld [vmem:[#allocation7 + $0x514] ss:$24 sps:$4 sm:$0xff]   ;;  %v3755_v18 = vld [vmem:[#allocation7 + $0x2d0] ss:$24 sps:$4 sm:$0xff]  }
  0x9a   :  { %660 = vmatprep.subr.bf16.mxu0 %v3685_v30  ;;  %2173 = vmatprep.subr.bf16.mxu1 %v3688_v31  ;;  %v3766_v20 = vld [vmem:[#allocation7 + $0x544] ss:$24 sps:$4 sm:$0xff]   ;;  %v4520_v22 = vld [vmem:[#allocation2] ss:$24 sps:$4 sm:$0xff]   ;;  %v3772_v25 = vld [vmem:[#allocation7 + $0x574] ss:$24 sps:$4 sm:$0xff]  }
  0x9b   :  { %v3769_v21 = vld [vmem:[#allocation7 + $0xc] ss:$24 sps:$4 sm:$0xff]   ;;  %v3764_v23 = vld [vmem:[#allocation7 + $0x540] ss:$24 sps:$4 sm:$0xff]   ;;  %v3775_v26 = vld [vmem:[#allocation7 + $0x3c] ss:$24 sps:$4 sm:$0xff]  }
  0x9c   :  { %v3767_v24 = vld [vmem:[#allocation7 + $0x8] ss:$24 sps:$4 sm:$0xff]   ;;  %v3773_v28 = vld [vmem:[#allocation7 + $0x38] ss:$24 sps:$4 sm:$0xff]   ;;  %v3778_v29 = vld [vmem:[#allocation7 + $0x5a4] ss:$24 sps:$4 sm:$0xff]  }
  0x9d   :  { %661 = vmatpush1.bf16.msra.mxu0 %v3683_v32  ;;  %2174 = vmatpush1.bf16.msra.mxu1 %v3686_v33  ;;  %v3770_v27 = vld [vmem:[#allocation7 + $0x570] ss:$24 sps:$4 sm:$0xff]   ;;  %v3781_v30 = vld [vmem:[#allocation7 + $0x6c] ss:$24 sps:$4 sm:$0xff]   ;;  %v3776_v31 = vld [vmem:[#allocation7 + $0x5a0] ss:$24 sps:$4 sm:$0xff]  }
  0x9e   :  { %2175 = vmatprep.subr.bf16.mxu1 %v3691_v34  ;;  %2210 = vmatprep.subr.bf16.mxu0 %v3694_v35  ;;  %v3779_v32 = vld [vmem:[#allocation7 + $0x68] ss:$24 sps:$4 sm:$0xff]   ;;  %v3784_v33 = vld [vmem:[#allocation7 + $0x5d4] ss:$24 sps:$4 sm:$0xff]   ;;  %s3137_s15 = sshll.u32 %s4369_s6, 4  ;;  %s3138_s15 = int_to_ptr.vmem [resolvable:$true] %s3137_s15 }
  0x9f   :  { %v3787_v34 = vld [vmem:[#allocation7 + $0x9c] ss:$24 sps:$4 sm:$0xff]   ;;  %v3782_v35 = vld [vmem:[#allocation7 + $0x5d0] ss:$24 sps:$4 sm:$0xff]   ;;  %s4325_s17 = scalar_lea.vmem %s3138_s15, 256  ;;  %p4330_p1 = scmp.lt.s32.totalorder %s3138_s15, %s3138_s15 }
  0xa0   :  { %3179 = vmatmul.mubr.msk.bf16.vlgmr.msra.gmra.mrb[4].mxu0 %vm564_vm0, %v3664_v19  ;;  %v3758_v19 = vld [vmem:[#allocation7 + $0x510] ss:$24 sps:$4 sm:$0xff]   ;;  %p4326_p0 = scmp.ne.s32.totalorder %s3138_s15, %s4325_s17  ;;  %p4331_p2 = scmp.lt.s32.totalorder %s4325_s17, %s4325_s17 }
  0xa1   :  { %2176 = vmatpush1.bf16.msra.mxu1 %v3689_v36  ;;  %2211 = vmatpush1.bf16.msra.mxu0 %v3692_v37  ;;  %v3785_v36 = vld [vmem:[#allocation7 + $0x98] ss:$24 sps:$4 sm:$0xff]   ;;  %v3793_v37 = vld [vmem:[#allocation7 + $0x604] ss:$24 sps:$4 sm:$0xff]  }
  0xa2   :  { %2177 = vmatprep.subr.bf16.mxu1 %v3697_v38  ;;  %2212 = vmatprep.subr.bf16.mxu0 %v3700_v39  ;;  %v3796_v38 = vld [vmem:[#allocation7 + $0xcc] ss:$24 sps:$4 sm:$0xff]   ;;  %v4524_v39 = vld [vmem:[#allocation2 + $0x8] ss:$24 sps:$4 sm:$0xff]   ;;  %p4332_p3 = por %p4331_p2, %p4330_p1 }
  0xa3   :  { %2242 = vmatprep.mubr.bf16.mxu0 %v4517_v10 }
  0xa4   :  { %p4333_p4 = pnand %p4332_p3, %p4326_p0 }
  0xa5   :  { %2178 = vmatpush1.bf16.msra.mxu1 %v3695_v40  ;;  %2213 = vmatpush1.bf16.msra.mxu0 %v3698_v41  ;;  %v3791_v40 = vld [vmem:[#allocation7 + $0x600] ss:$24 sps:$4 sm:$0xff]  }
  0xa6   :  { %2179 = vmatprep.subr.bf16.mxu1 %v3703_v42  ;;  %2214 = vmatprep.subr.bf16.mxu0 %v3706_v43  ;;  %v3794_v41 = vld [vmem:[#allocation7 + $0xc8] ss:$24 sps:$4 sm:$0xff]   ;;  %v3799_v42 = vld [vmem:[#allocation7 + $0x634] ss:$24 sps:$4 sm:$0xff]  }
  0xa7   :  { %v3802_v43 = vld [vmem:[#allocation7 + $0xfc] ss:$24 sps:$4 sm:$0xff]  }
  0xa9   :  { %2180 = vmatpush1.bf16.msra.mxu1 %v3701_v44  ;;  %2215 = vmatpush1.bf16.msra.mxu0 %v3704_v45  ;;  %v3797_v44 = vld [vmem:[#allocation7 + $0x630] ss:$24 sps:$4 sm:$0xff]  }
  0xaa   :  { %2181 = vmatprep.subr.bf16.mxu1 %v3709_v46  ;;  %2216 = vmatprep.subr.bf16.mxu0 %v3712_v47  ;;  %v3800_v45 = vld [vmem:[#allocation7 + $0xf8] ss:$24 sps:$4 sm:$0xff]   ;;  %v3805_v46 = vld [vmem:[#allocation7 + $0x664] ss:$24 sps:$4 sm:$0xff]  }
  0xab   :  { %v3808_v47 = vld [vmem:[#allocation7 + $0x12c] ss:$24 sps:$4 sm:$0xff]  }
  0xad   :  { %2182 = vmatpush1.bf16.msra.mxu1 %v3707_v48  ;;  %2217 = vmatpush1.bf16.msra.mxu0 %v3710_v49  ;;  %v3803_v48 = vld [vmem:[#allocation7 + $0x660] ss:$24 sps:$4 sm:$0xff]  }
  0xae   :  { %2183 = vmatprep.subr.bf16.mxu1 %v3715_v50  ;;  %2218 = vmatprep.subr.bf16.mxu0 %v3718_v51  ;;  %v3806_v49 = vld [vmem:[#allocation7 + $0x128] ss:$24 sps:$4 sm:$0xff]   ;;  %v3811_v50 = vld [vmem:[#allocation7 + $0x694] ss:$24 sps:$4 sm:$0xff]  }
  0xaf   :  { %v3814_v51 = vld [vmem:[#allocation7 + $0x15c] ss:$24 sps:$4 sm:$0xff]  }
  0xb1   :  { %2184 = vmatpush1.bf16.msra.mxu1 %v3713_v52  ;;  %2219 = vmatpush1.bf16.msra.mxu0 %v3716_v53  ;;  %v3809_v52 = vld [vmem:[#allocation7 + $0x690] ss:$24 sps:$4 sm:$0xff]  }
  0xb2   :  { %2185 = vmatprep.subr.bf16.mxu1 %v3721_v54  ;;  %2220 = vmatprep.subr.bf16.mxu0 %v3724_v55  ;;  %v3812_v53 = vld [vmem:[#allocation7 + $0x158] ss:$24 sps:$4 sm:$0xff]   ;;  %v3817_v54 = vld [vmem:[#allocation7 + $0x6c4] ss:$24 sps:$4 sm:$0xff]  }
  0xb3   :  { %v3820_v55 = vld [vmem:[#allocation7 + $0x18c] ss:$24 sps:$4 sm:$0xff]  }
  0xb5   :  { %2186 = vmatpush1.bf16.msra.mxu1 %v3719_v56  ;;  %2221 = vmatpush1.bf16.msra.mxu0 %v3722_v57  ;;  %v3815_v56 = vld [vmem:[#allocation7 + $0x6c0] ss:$24 sps:$4 sm:$0xff]   ;;  %v4527_v57 = vld [vmem:[#allocation2 + $0x14] ss:$24 sps:$4 sm:$0xff]  }
  0xb6   :  { %2187 = vmatprep.subr.bf16.mxu1 %v3727_v58  ;;  %2222 = vmatprep.subr.bf16.mxu0 %v3730_v59  ;;  %v3818_v58 = vld [vmem:[#allocation7 + $0x188] ss:$24 sps:$4 sm:$0xff]   ;;  %v3823_v59 = vld [vmem:[#allocation7 + $0x6f4] ss:$24 sps:$4 sm:$0xff]  }
  0xb9   :  { %2188 = vmatpush1.bf16.msra.mxu1 %v3725_v60  ;;  %2223 = vmatpush1.bf16.msra.mxu0 %v3728_v62  ;;  %v3826_v60 = vld [vmem:[#allocation7 + $0x1bc] ss:$24 sps:$4 sm:$0xff]   ;;  %v3821_v62 = vld [vmem:[#allocation7 + $0x6f0] ss:$24 sps:$4 sm:$0xff]  }
  0xba   :  { %2189 = vmatprep.subr.bf16.mxu1 %v3733_v63  ;;  %2224 = vmatprep.subr.bf16.mxu0 %v3736_v0  ;;  %v3824_v63 = vld [vmem:[#allocation7 + $0x1b8] ss:$24 sps:$4 sm:$0xff]   ;;  %v3829_v0 = vld [vmem:[#allocation7 + $0x724] ss:$24 sps:$4 sm:$0xff]  }
  0xbd   :  { %2190 = vmatpush1.bf16.msra.mxu1 %v3731_v1  ;;  %2225 = vmatpush1.bf16.msra.mxu0 %v3734_v2  ;;  %v3832_v1 = vld [vmem:[#allocation7 + $0x1ec] ss:$24 sps:$4 sm:$0xff]   ;;  %v3827_v2 = vld [vmem:[#allocation7 + $0x720] ss:$24 sps:$4 sm:$0xff]  }
  0xbe   :  { %2191 = vmatprep.subr.bf16.mxu1 %v3739_v3  ;;  %2226 = vmatprep.subr.bf16.mxu0 %v3742_v4  ;;  %v3830_v3 = vld [vmem:[#allocation7 + $0x1e8] ss:$24 sps:$4 sm:$0xff]   ;;  %v3835_v4 = vld [vmem:[#allocation7 + $0x754] ss:$24 sps:$4 sm:$0xff]  }
  0xc1   :  { %2192 = vmatpush1.bf16.msra.mxu1 %v3737_v5  ;;  %2227 = vmatpush1.bf16.msra.mxu0 %v3740_v6  ;;  %v3838_v5 = vld [vmem:[#allocation7 + $0x21c] ss:$24 sps:$4 sm:$0xff]   ;;  %v3833_v6 = vld [vmem:[#allocation7 + $0x750] ss:$24 sps:$4 sm:$0xff]  }
  0xc2   :  { %2193 = vmatprep.subr.bf16.mxu1 %v3745_v7  ;;  %2228 = vmatprep.subr.bf16.mxu0 %v3748_v8  ;;  %v3836_v7 = vld [vmem:[#allocation7 + $0x218] ss:$24 sps:$4 sm:$0xff]   ;;  %v3841_v8 = vld [vmem:[#allocation7 + $0x784] ss:$24 sps:$4 sm:$0xff]  }
  0xc5   :  { %2194 = vmatpush1.bf16.msra.mxu1 %v3743_v9  ;;  %2229 = vmatpush1.bf16.msra.mxu0 %v3746_v11  ;;  %v3844_v9 = vld [vmem:[#allocation7 + $0x24c] ss:$24 sps:$4 sm:$0xff]   ;;  %v3839_v11 = vld [vmem:[#allocation7 + $0x780] ss:$24 sps:$4 sm:$0xff]  }
  0xc6   :  { %2195 = vmatprep.subr.bf16.mxu1 %v3751_v12  ;;  %2230 = vmatprep.subr.bf16.mxu0 %v3754_v13  ;;  %v3842_v12 = vld [vmem:[#allocation7 + $0x248] ss:$24 sps:$4 sm:$0xff]   ;;  %v3847_v13 = vld [vmem:[#allocation7 + $0x7b4] ss:$24 sps:$4 sm:$0xff]  }
  0xc9   :  { %2196 = vmatpush1.bf16.msra.mxu1 %v3749_v14  ;;  %2231 = vmatpush1.bf16.msra.mxu0 %v3752_v15  ;;  %v3850_v14 = vld [vmem:[#allocation7 + $0x27c] ss:$24 sps:$4 sm:$0xff]   ;;  %v3845_v15 = vld [vmem:[#allocation7 + $0x7b0] ss:$24 sps:$4 sm:$0xff]  }
  0xca   :  { %2197 = vmatprep.subr.bf16.mxu1 %v3757_v16  ;;  %2232 = vmatprep.subr.bf16.mxu0 %v3760_v17  ;;  %v3848_v16 = vld [vmem:[#allocation7 + $0x278] ss:$24 sps:$4 sm:$0xff]   ;;  %v3853_v17 = vld [vmem:[#allocation7 + $0x7e4] ss:$24 sps:$4 sm:$0xff]  }
  0xcd   :  { %2198 = vmatpush1.bf16.msra.mxu1 %v3755_v18  ;;  %2233 = vmatpush1.bf16.msra.mxu0 %v3758_v19  ;;  %v3856_v18 = vld [vmem:[#allocation7 + $0x2ac] ss:$24 sps:$4 sm:$0xff]   ;;  %v3851_v19 = vld [vmem:[#allocation7 + $0x7e0] ss:$24 sps:$4 sm:$0xff]  }
  0xce   :  { %2234 = vmatprep.subr.bf16.mxu0 %v3766_v20  ;;  %2296 = vmatprep.subr.bf16.mxu1 %v3769_v21  ;;  %v3854_v20 = vld [vmem:[#allocation7 + $0x2a8] ss:$24 sps:$4 sm:$0xff]   ;;  %v3859_v21 = vld [vmem:[#allocation7 + $0x814] ss:$24 sps:$4 sm:$0xff]  }
  0xd0   :  { %2200 = vmatmul.mubr.bf16.vlgmr.msra.gmra.mrb[4].mxu1 %v4520_v22 }
  0xd1   :  { %2235 = vmatpush1.bf16.msra.mxu0 %v3764_v23  ;;  %2297 = vmatpush1.bf16.msra.mxu1 %v3767_v24  ;;  %v3862_v23 = vld [vmem:[#allocation7 + $0x2dc] ss:$24 sps:$4 sm:$0xff]   ;;  %v3857_v24 = vld [vmem:[#allocation7 + $0x810] ss:$24 sps:$4 sm:$0xff]  }
  0xd2   :  { %2236 = vmatprep.subr.bf16.mxu0 %v3772_v25  ;;  %2298 = vmatprep.subr.bf16.mxu1 %v3775_v26  ;;  %v3860_v25 = vld [vmem:[#allocation7 + $0x2d8] ss:$24 sps:$4 sm:$0xff]   ;;  %v3865_v26 = vld [vmem:[#allocation7 + $0x844] ss:$24 sps:$4 sm:$0xff]  }
  0xd3   :  { %2328 = vmatprep.mubr.bf16.mxu1 %v4514_v61 }
  0xd5   :  { %2237 = vmatpush1.bf16.msra.mxu0 %v3770_v27  ;;  %2299 = vmatpush1.bf16.msra.mxu1 %v3773_v28  ;;  %v3868_v27 = vld [vmem:[#allocation7 + $0x30c] ss:$24 sps:$4 sm:$0xff]   ;;  %v3863_v28 = vld [vmem:[#allocation7 + $0x840] ss:$24 sps:$4 sm:$0xff]  }
  0xd6   :  { %2238 = vmatprep.subr.bf16.mxu0 %v3778_v29  ;;  %2300 = vmatprep.subr.bf16.mxu1 %v3781_v30  ;;  %v3866_v29 = vld [vmem:[#allocation7 + $0x308] ss:$24 sps:$4 sm:$0xff]   ;;  %v3871_v30 = vld [vmem:[#allocation7 + $0x874] ss:$24 sps:$4 sm:$0xff]  }
  0xd9   :  { %2239 = vmatpush1.bf16.msra.mxu0 %v3776_v31  ;;  %2301 = vmatpush1.bf16.msra.mxu1 %v3779_v32  ;;  %v3874_v31 = vld [vmem:[#allocation7 + $0x33c] ss:$24 sps:$4 sm:$0xff]   ;;  %v3869_v32 = vld [vmem:[#allocation7 + $0x870] ss:$24 sps:$4 sm:$0xff]  }
  0xda   :  { %2240 = vmatprep.subr.bf16.mxu0 %v3784_v33  ;;  %2302 = vmatprep.subr.bf16.mxu1 %v3787_v34  ;;  %v3872_v33 = vld [vmem:[#allocation7 + $0x338] ss:$24 sps:$4 sm:$0xff]   ;;  %v3877_v34 = vld [vmem:[#allocation7 + $0x8a4] ss:$24 sps:$4 sm:$0xff]  }
  0xdd   :  { %2241 = vmatpush1.bf16.msra.mxu0 %v3782_v35  ;;  %2303 = vmatpush1.bf16.msra.mxu1 %v3785_v36  ;;  %v3880_v35 = vld [vmem:[#allocation7 + $0x36c] ss:$24 sps:$4 sm:$0xff]   ;;  %v3875_v36 = vld [vmem:[#allocation7 + $0x8a0] ss:$24 sps:$4 sm:$0xff]  }
  0xde   :  { %2253 = vmatprep.subr.bf16.mxu0 %v3793_v37  ;;  %2304 = vmatprep.subr.bf16.mxu1 %v3796_v38  ;;  %v3878_v37 = vld [vmem:[#allocation7 + $0x368] ss:$24 sps:$4 sm:$0xff]   ;;  %v3883_v38 = vld [vmem:[#allocation7 + $0x8d4] ss:$24 sps:$4 sm:$0xff]  }
  0xe0   :  { %2243 = vmatmul.mubr.bf16.vlgmr.msra.gmra.mrb[8].mxu0 %v4524_v39 }
  0xe1   :  { %2254 = vmatpush1.bf16.msra.mxu0 %v3791_v40  ;;  %2305 = vmatpush1.bf16.msra.mxu1 %v3794_v41  ;;  %v3886_v40 = vld [vmem:[#allocation7 + $0x39c] ss:$24 sps:$4 sm:$0xff]   ;;  %v3881_v41 = vld [vmem:[#allocation7 + $0x8d0] ss:$24 sps:$4 sm:$0xff]  }
  0xe2   :  { %2255 = vmatprep.subr.bf16.mxu0 %v3799_v42  ;;  %2306 = vmatprep.subr.bf16.mxu1 %v3802_v43  ;;  %v3892_v42 = vld [vmem:[#allocation7 + $0x3cc] ss:$24 sps:$4 sm:$0xff]  }
  0xe3   :  { %2285 = vmatprep.mubr.bf16.mxu0 %v4527_v57  ;;  %v3895_v43 = vld [vmem:[#allocation7 + $0x14] ss:$24 sps:$4 sm:$0xff]  }
  0xe5   :  { %2256 = vmatpush1.bf16.msra.mxu0 %v3797_v44  ;;  %2307 = vmatpush1.bf16.msra.mxu1 %v3800_v45  ;;  %v4532_v44 = vld [vmem:[#allocation2 + $0x10] ss:$24 sps:$4 sm:$0xff]   ;;  %v3890_v45 = vld [vmem:[#allocation7 + $0x3c8] ss:$24 sps:$4 sm:$0xff]  }
  0xe6   :  { %2257 = vmatprep.subr.bf16.mxu0 %v3805_v46  ;;  %2308 = vmatprep.subr.bf16.mxu1 %v3808_v47  ;;  %v3898_v46 = vld [vmem:[#allocation7 + $0x3fc] ss:$24 sps:$4 sm:$0xff]  }
  0xe7   :  { %v3901_v47 = vld [vmem:[#allocation7 + $0x44] ss:$24 sps:$4 sm:$0xff]  }
  0xe9   :  { %2258 = vmatpush1.bf16.msra.mxu0 %v3803_v48  ;;  %2309 = vmatpush1.bf16.msra.mxu1 %v3806_v49  ;;  %v3896_v48 = vld [vmem:[#allocation7 + $0x3f8] ss:$24 sps:$4 sm:$0xff]  }
  0xea   :  { %2259 = vmatprep.subr.bf16.mxu0 %v3811_v50  ;;  %2310 = vmatprep.subr.bf16.mxu1 %v3814_v51  ;;  %v3899_v49 = vld [vmem:[#allocation7 + $0x40] ss:$24 sps:$4 sm:$0xff]   ;;  %v3904_v50 = vld [vmem:[#allocation7 + $0x42c] ss:$24 sps:$4 sm:$0xff]  }
  0xeb   :  { %v3907_v51 = vld [vmem:[#allocation7 + $0x74] ss:$24 sps:$4 sm:$0xff]  }
  0xed   :  { %2260 = vmatpush1.bf16.msra.mxu0 %v3809_v52  ;;  %2311 = vmatpush1.bf16.msra.mxu1 %v3812_v53  ;;  %v3902_v52 = vld [vmem:[#allocation7 + $0x428] ss:$24 sps:$4 sm:$0xff]  }
  0xee   :  { %2261 = vmatprep.subr.bf16.mxu0 %v3817_v54  ;;  %2312 = vmatprep.subr.bf16.mxu1 %v3820_v55  ;;  %v3905_v53 = vld [vmem:[#allocation7 + $0x70] ss:$24 sps:$4 sm:$0xff]   ;;  %v3910_v54 = vld [vmem:[#allocation7 + $0x45c] ss:$24 sps:$4 sm:$0xff]  }
  0xef   :  { %v3913_v55 = vld [vmem:[#allocation7 + $0xa4] ss:$24 sps:$4 sm:$0xff]  }
  0xf1   :  { %2262 = vmatpush1.bf16.msra.mxu0 %v3815_v56  ;;  %2313 = vmatpush1.bf16.msra.mxu1 %v3818_v58  ;;  %v3908_v56 = vld [vmem:[#allocation7 + $0x458] ss:$24 sps:$4 sm:$0xff]  }
  0xf2   :  { %2263 = vmatprep.subr.bf16.mxu0 %v3823_v59  ;;  %2314 = vmatprep.subr.bf16.mxu1 %v3826_v60  ;;  %v3911_v58 = vld [vmem:[#allocation7 + $0xa0] ss:$24 sps:$4 sm:$0xff]   ;;  %v3916_v59 = vld [vmem:[#allocation7 + $0x48c] ss:$24 sps:$4 sm:$0xff]  }
  0xf3   :  { %v3919_v60 = vld [vmem:[#allocation7 + $0xd4] ss:$24 sps:$4 sm:$0xff]  }
  0xf5   :  { %2264 = vmatpush1.bf16.msra.mxu0 %v3821_v62  ;;  %2315 = vmatpush1.bf16.msra.mxu1 %v3824_v63  ;;  %v3914_v62 = vld [vmem:[#allocation7 + $0x488] ss:$24 sps:$4 sm:$0xff]   ;;  %v3922_v63 = vld [vmem:[#allocation7 + $0x4bc] ss:$24 sps:$4 sm:$0xff]  }
  0xf6   :  { %2265 = vmatprep.subr.bf16.mxu0 %v3829_v0  ;;  %2316 = vmatprep.subr.bf16.mxu1 %v3832_v1  ;;  %v3925_v0 = vld [vmem:[#allocation7 + $0x104] ss:$24 sps:$4 sm:$0xff]   ;;  %v3920_v1 = vld [vmem:[#allocation7 + $0x4b8] ss:$24 sps:$4 sm:$0xff]  }
  0xf9   :  { %2266 = vmatpush1.bf16.msra.mxu0 %v3827_v2  ;;  %2317 = vmatpush1.bf16.msra.mxu1 %v3830_v3  ;;  %v3923_v2 = vld [vmem:[#allocation7 + $0x100] ss:$24 sps:$4 sm:$0xff]   ;;  %v3928_v3 = vld [vmem:[#allocation7 + $0x4ec] ss:$24 sps:$4 sm:$0xff]  }
  0xfa   :  { %2267 = vmatprep.subr.bf16.mxu0 %v3835_v4  ;;  %2318 = vmatprep.subr.bf16.mxu1 %v3838_v5  ;;  %v3931_v4 = vld [vmem:[#allocation7 + $0x134] ss:$24 sps:$4 sm:$0xff]   ;;  %v3926_v5 = vld [vmem:[#allocation7 + $0x4e8] ss:$24 sps:$4 sm:$0xff]  }
  0xfd   :  { %2268 = vmatpush1.bf16.msra.mxu0 %v3833_v6  ;;  %2319 = vmatpush1.bf16.msra.mxu1 %v3836_v7  ;;  %v3929_v6 = vld [vmem:[#allocation7 + $0x130] ss:$24 sps:$4 sm:$0xff]   ;;  %v3934_v7 = vld [vmem:[#allocation7 + $0x51c] ss:$24 sps:$4 sm:$0xff]  }
  0xfe   :  { %2269 = vmatprep.subr.bf16.mxu0 %v3841_v8  ;;  %2320 = vmatprep.subr.bf16.mxu1 %v3844_v9  ;;  %v3937_v8 = vld [vmem:[#allocation7 + $0x164] ss:$24 sps:$4 sm:$0xff]   ;;  %v3932_v9 = vld [vmem:[#allocation7 + $0x518] ss:$24 sps:$4 sm:$0xff]  }
 0x101   :  { %2270 = vmatpush1.bf16.msra.mxu0 %v3839_v11  ;;  %2321 = vmatpush1.bf16.msra.mxu1 %v3842_v12  ;;  %v3935_v11 = vld [vmem:[#allocation7 + $0x160] ss:$24 sps:$4 sm:$0xff]   ;;  %v3940_v12 = vld [vmem:[#allocation7 + $0x54c] ss:$24 sps:$4 sm:$0xff]  }
 0x102   :  { %2271 = vmatprep.subr.bf16.mxu0 %v3847_v13  ;;  %2322 = vmatprep.subr.bf16.mxu1 %v3850_v14  ;;  %v3943_v13 = vld [vmem:[#allocation7 + $0x194] ss:$24 sps:$4 sm:$0xff]   ;;  %v3938_v14 = vld [vmem:[#allocation7 + $0x548] ss:$24 sps:$4 sm:$0xff]  }
 0x105   :  { %2272 = vmatpush1.bf16.msra.mxu0 %v3845_v15  ;;  %2323 = vmatpush1.bf16.msra.mxu1 %v3848_v16  ;;  %v3941_v15 = vld [vmem:[#allocation7 + $0x190] ss:$24 sps:$4 sm:$0xff]   ;;  %v3946_v16 = vld [vmem:[#allocation7 + $0x57c] ss:$24 sps:$4 sm:$0xff]  }
 0x106   :  { %2273 = vmatprep.subr.bf16.mxu0 %v3853_v17  ;;  %2324 = vmatprep.subr.bf16.mxu1 %v3856_v18  ;;  %v3949_v17 = vld [vmem:[#allocation7 + $0x1c4] ss:$24 sps:$4 sm:$0xff]   ;;  %v3944_v18 = vld [vmem:[#allocation7 + $0x578] ss:$24 sps:$4 sm:$0xff]  }
 0x109   :  { %2274 = vmatpush1.bf16.msra.mxu0 %v3851_v19  ;;  %2325 = vmatpush1.bf16.msra.mxu1 %v3854_v20  ;;  %v3947_v19 = vld [vmem:[#allocation7 + $0x1c0] ss:$24 sps:$4 sm:$0xff]   ;;  %v3952_v20 = vld [vmem:[#allocation7 + $0x5ac] ss:$24 sps:$4 sm:$0xff]  }
 0x10a   :  { %2275 = vmatprep.subr.bf16.mxu0 %v3859_v21  ;;  %2326 = vmatprep.subr.bf16.mxu1 %v3862_v23  ;;  %v3955_v21 = vld [vmem:[#allocation7 + $0x1f4] ss:$24 sps:$4 sm:$0xff]   ;;  %v3950_v23 = vld [vmem:[#allocation7 + $0x5a8] ss:$24 sps:$4 sm:$0xff]  }
 0x10d   :  { %2276 = vmatpush1.bf16.msra.mxu0 %v3857_v24  ;;  %2327 = vmatpush1.bf16.msra.mxu1 %v3860_v25  ;;  %v3953_v24 = vld [vmem:[#allocation7 + $0x1f0] ss:$24 sps:$4 sm:$0xff]   ;;  %v3958_v25 = vld [vmem:[#allocation7 + $0x5dc] ss:$24 sps:$4 sm:$0xff]  }
 0x10e   :  { %2277 = vmatprep.subr.bf16.mxu0 %v3865_v26  ;;  %2339 = vmatprep.subr.bf16.mxu1 %v3868_v27  ;;  %v3961_v26 = vld [vmem:[#allocation7 + $0x224] ss:$24 sps:$4 sm:$0xff]   ;;  %v3956_v27 = vld [vmem:[#allocation7 + $0x5d8] ss:$24 sps:$4 sm:$0xff]  }
 0x110   :  { %2329 = vmatmul.mubr.bf16.vlgmr.msra.gmra.mrb[0].mxu1 %v4520_v22  ;;  %v3884_v22 = vld [vmem:[#allocation7 + $0x398] ss:$24 sps:$4 sm:$0xff]  }
 0x111   :  { %2278 = vmatpush1.bf16.msra.mxu0 %v3863_v28  ;;  %2340 = vmatpush1.bf16.msra.mxu1 %v3866_v29  ;;  %v3959_v28 = vld [vmem:[#allocation7 + $0x220] ss:$24 sps:$4 sm:$0xff]   ;;  %v3964_v29 = vld [vmem:[#allocation7 + $0x60c] ss:$24 sps:$4 sm:$0xff]  }
 0x112   :  { %2279 = vmatprep.subr.bf16.mxu0 %v3871_v30  ;;  %2341 = vmatprep.subr.bf16.mxu1 %v3874_v31  ;;  %v3967_v30 = vld [vmem:[#allocation7 + $0x254] ss:$24 sps:$4 sm:$0xff]   ;;  %v3962_v31 = vld [vmem:[#allocation7 + $0x608] ss:$24 sps:$4 sm:$0xff]  }
 0x113   :  { %2371 = vmatprep.mubr.bf16.mxu1 %v4517_v10  ;;  %v3893_v10 = vld [vmem:[#allocation7 + $0x10] ss:$24 sps:$4 sm:$0xff]  }
 0x115   :  { %2280 = vmatpush1.bf16.msra.mxu0 %v3869_v32  ;;  %2342 = vmatpush1.bf16.msra.mxu1 %v3872_v33  ;;  %v3965_v32 = vld [vmem:[#allocation7 + $0x250] ss:$24 sps:$4 sm:$0xff]   ;;  %v3970_v33 = vld [vmem:[#allocation7 + $0x63c] ss:$24 sps:$4 sm:$0xff]  }
 0x116   :  { %2281 = vmatprep.subr.bf16.mxu0 %v3877_v34  ;;  %2343 = vmatprep.subr.bf16.mxu1 %v3880_v35  ;;  %v3973_v34 = vld [vmem:[#allocation7 + $0x284] ss:$24 sps:$4 sm:$0xff]   ;;  %v3968_v35 = vld [vmem:[#allocation7 + $0x638] ss:$24 sps:$4 sm:$0xff]  }
 0x119   :  { %2282 = vmatpush1.bf16.msra.mxu0 %v3875_v36  ;;  %2344 = vmatpush1.bf16.msra.mxu1 %v3878_v37  ;;  %v3971_v36 = vld [vmem:[#allocation7 + $0x280] ss:$24 sps:$4 sm:$0xff]   ;;  %v3976_v37 = vld [vmem:[#allocation7 + $0x66c] ss:$24 sps:$4 sm:$0xff]  }
 0x11a   :  { %2283 = vmatprep.subr.bf16.mxu0 %v3883_v38  ;;  %2345 = vmatprep.subr.bf16.mxu1 %v3886_v40  ;;  %v3979_v38 = vld [vmem:[#allocation7 + $0x2b4] ss:$24 sps:$4 sm:$0xff]   ;;  %v3974_v40 = vld [vmem:[#allocation7 + $0x668] ss:$24 sps:$4 sm:$0xff]  }
 0x11d   :  { %2284 = vmatpush1.bf16.msra.mxu0 %v3881_v41  ;;  %2346 = vmatpush1.bf16.msra.mxu1 %v3884_v22  ;;  %v3977_v41 = vld [vmem:[#allocation7 + $0x2b0] ss:$24 sps:$4 sm:$0xff]   ;;  %v3982_v22 = vld [vmem:[#allocation7 + $0x69c] ss:$24 sps:$4 sm:$0xff]  }
 0x11e   :  { %2347 = vmatprep.subr.bf16.mxu1 %v3892_v42  ;;  %2425 = vmatprep.subr.bf16.mxu0 %v3895_v43  ;;  %v3985_v42 = vld [vmem:[#allocation7 + $0x2e4] ss:$24 sps:$4 sm:$0xff]   ;;  %v3980_v43 = vld [vmem:[#allocation7 + $0x698] ss:$24 sps:$4 sm:$0xff]  }
 0x120   :  { %2286 = vmatmul.mubr.bf16.vlgmr.msra.gmra.mrb[8].mxu0 %v4532_v44 }
 0x121   :  { %2348 = vmatpush1.bf16.msra.mxu1 %v3890_v45  ;;  %2426 = vmatpush1.bf16.msra.mxu0 %v3893_v10  ;;  %v3983_v45 = vld [vmem:[#allocation7 + $0x2e0] ss:$24 sps:$4 sm:$0xff]   ;;  %v3991_v10 = vld [vmem:[#allocation7 + $0x314] ss:$24 sps:$4 sm:$0xff]  }
 0x122   :  { %2349 = vmatprep.subr.bf16.mxu1 %v3898_v46  ;;  %2427 = vmatprep.subr.bf16.mxu0 %v3901_v47  ;;  %v3986_v46 = vld [vmem:[#allocation7 + $0x6c8] ss:$24 sps:$4 sm:$0xff]  }
 0x123   :  { %2457 = vmatprep.mubr.bf16.mxu0 %v4514_v61  ;;  %v3917_v61 = vld [vmem:[#allocation7 + $0xd0] ss:$24 sps:$4 sm:$0xff]  }
 0x124   :  { %v3989_v47 = vld [vmem:[#allocation7 + $0x310] ss:$24 sps:$4 sm:$0xff]  }
 0x125   :  { %2350 = vmatpush1.bf16.msra.mxu1 %v3896_v48  ;;  %2428 = vmatpush1.bf16.msra.mxu0 %v3899_v49  ;;  %v3994_v48 = vld [vmem:[#allocation7 + $0x6fc] ss:$24 sps:$4 sm:$0xff]   ;;  %v4166_v49 = vld [vmem:[#allocation2] ss:$24 sps:$4 sm:$0xff]  }
 0x126   :  { %2351 = vmatprep.subr.bf16.mxu1 %v3904_v50  ;;  %2429 = vmatprep.subr.bf16.mxu0 %v3907_v51  ;;  %v3992_v50 = vld [vmem:[#allocation7 + $0x6f8] ss:$24 sps:$4 sm:$0xff]  }
 0x127   :  { %v3995_v51 = vld [vmem:[#allocation7 + $0x340] ss:$24 sps:$4 sm:$0xff]  }
 0x129   :  { %2352 = vmatpush1.bf16.msra.mxu1 %v3902_v52  ;;  %2430 = vmatpush1.bf16.msra.mxu0 %v3905_v53  ;;  %v4000_v52 = vld [vmem:[#allocation7 + $0x72c] ss:$24 sps:$4 sm:$0xff]  }
 0x12a   :  { %2353 = vmatprep.subr.bf16.mxu1 %v3910_v54  ;;  %2431 = vmatprep.subr.bf16.mxu0 %v3913_v55  ;;  %v4003_v53 = vld [vmem:[#allocation7 + $0x374] ss:$24 sps:$4 sm:$0xff]   ;;  %v3998_v55 = vld [vmem:[#allocation7 + $0x728] ss:$24 sps:$4 sm:$0xff]  }
 0x12d   :  { %2354 = vmatpush1.bf16.msra.mxu1 %v3908_v56  ;;  %2432 = vmatpush1.bf16.msra.mxu0 %v3911_v58  ;;  %v4001_v56 = vld [vmem:[#allocation7 + $0x370] ss:$24 sps:$4 sm:$0xff]   ;;  %v4167_v58 = vld [vmem:[#allocation2 + $0xc] ss:$24 sps:$4 sm:$0xff]  }
 0x12e   :  { %2355 = vmatprep.subr.bf16.mxu1 %v3916_v59  ;;  %2433 = vmatprep.subr.bf16.mxu0 %v3919_v60  ;;  %v4006_v60 = vld [vmem:[#allocation7 + $0x75c] ss:$24 sps:$4 sm:$0xff]  }
 0x131   :  { %2356 = vmatpush1.bf16.msra.mxu1 %v3914_v62  ;;  %2434 = vmatpush1.bf16.msra.mxu0 %v3917_v61  ;;  %v4009_v62 = vld [vmem:[#allocation7 + $0x3a4] ss:$24 sps:$4 sm:$0xff]  }
 0x132   :  { %2357 = vmatprep.subr.bf16.mxu1 %v3922_v63  ;;  %2435 = vmatprep.subr.bf16.mxu0 %v3925_v0  ;;  %v4004_v0 = vld [vmem:[#allocation7 + $0x758] ss:$24 sps:$4 sm:$0xff]  }
 0x135   :  { %2358 = vmatpush1.bf16.msra.mxu1 %v3920_v1  ;;  %2436 = vmatpush1.bf16.msra.mxu0 %v3923_v2  ;;  %v4007_v1 = vld [vmem:[#allocation7 + $0x3a0] ss:$24 sps:$4 sm:$0xff]   ;;  %v4012_v2 = vld [vmem:[#allocation7 + $0x78c] ss:$24 sps:$4 sm:$0xff]  }
 0x136   :  { %2359 = vmatprep.subr.bf16.mxu1 %v3928_v3  ;;  %2437 = vmatprep.subr.bf16.mxu0 %v3931_v4  ;;  %v4015_v3 = vld [vmem:[#allocation7 + $0x3d4] ss:$24 sps:$4 sm:$0xff]   ;;  %v4010_v4 = vld [vmem:[#allocation7 + $0x788] ss:$24 sps:$4 sm:$0xff]  }
 0x139   :  { %2360 = vmatpush1.bf16.msra.mxu1 %v3926_v5  ;;  %2438 = vmatpush1.bf16.msra.mxu0 %v3929_v6  ;;  %v4013_v5 = vld [vmem:[#allocation7 + $0x3d0] ss:$24 sps:$4 sm:$0xff]   ;;  %v4018_v6 = vld [vmem:[#allocation7 + $0x7bc] ss:$24 sps:$4 sm:$0xff]  }
 0x13a   :  { %2361 = vmatprep.subr.bf16.mxu1 %v3934_v7  ;;  %2439 = vmatprep.subr.bf16.mxu0 %v3937_v8  ;;  %v4021_v7 = vld [vmem:[#allocation7 + $0x404] ss:$24 sps:$4 sm:$0xff]   ;;  %v4016_v8 = vld [vmem:[#allocation7 + $0x7b8] ss:$24 sps:$4 sm:$0xff]  }
 0x13d   :  { %2362 = vmatpush1.bf16.msra.mxu1 %v3932_v9  ;;  %2440 = vmatpush1.bf16.msra.mxu0 %v3935_v11  ;;  %v4019_v9 = vld [vmem:[#allocation7 + $0x400] ss:$24 sps:$4 sm:$0xff]   ;;  %v4024_v11 = vld [vmem:[#allocation7 + $0x7ec] ss:$24 sps:$4 sm:$0xff]  }
 0x13e   :  { %2363 = vmatprep.subr.bf16.mxu1 %v3940_v12  ;;  %2441 = vmatprep.subr.bf16.mxu0 %v3943_v13  ;;  %v4027_v12 = vld [vmem:[#allocation7 + $0x434] ss:$24 sps:$4 sm:$0xff]   ;;  %v4022_v13 = vld [vmem:[#allocation7 + $0x7e8] ss:$24 sps:$4 sm:$0xff]  }
 0x141   :  { %2364 = vmatpush1.bf16.msra.mxu1 %v3938_v14  ;;  %2442 = vmatpush1.bf16.msra.mxu0 %v3941_v15  ;;  %v4025_v14 = vld [vmem:[#allocation7 + $0x430] ss:$24 sps:$4 sm:$0xff]   ;;  %v4030_v15 = vld [vmem:[#allocation7 + $0x81c] ss:$24 sps:$4 sm:$0xff]  }
 0x142   :  { %2365 = vmatprep.subr.bf16.mxu1 %v3946_v16  ;;  %2443 = vmatprep.subr.bf16.mxu0 %v3949_v17  ;;  %v4033_v16 = vld [vmem:[#allocation7 + $0x464] ss:$24 sps:$4 sm:$0xff]   ;;  %v4028_v17 = vld [vmem:[#allocation7 + $0x818] ss:$24 sps:$4 sm:$0xff]  }
 0x145   :  { %2366 = vmatpush1.bf16.msra.mxu1 %v3944_v18  ;;  %2444 = vmatpush1.bf16.msra.mxu0 %v3947_v19  ;;  %v4031_v18 = vld [vmem:[#allocation7 + $0x460] ss:$24 sps:$4 sm:$0xff]   ;;  %v4036_v19 = vld [vmem:[#allocation7 + $0x84c] ss:$24 sps:$4 sm:$0xff]  }
 0x146   :  { %2367 = vmatprep.subr.bf16.mxu1 %v3952_v20  ;;  %2445 = vmatprep.subr.bf16.mxu0 %v3955_v21  ;;  %v4039_v20 = vld [vmem:[#allocation7 + $0x494] ss:$24 sps:$4 sm:$0xff]   ;;  %v4034_v21 = vld [vmem:[#allocation7 + $0x848] ss:$24 sps:$4 sm:$0xff]  }
 0x149   :  { %2368 = vmatpush1.bf16.msra.mxu1 %v3950_v23  ;;  %2446 = vmatpush1.bf16.msra.mxu0 %v3953_v24  ;;  %v4037_v23 = vld [vmem:[#allocation7 + $0x490] ss:$24 sps:$4 sm:$0xff]   ;;  %v4042_v24 = vld [vmem:[#allocation7 + $0x87c] ss:$24 sps:$4 sm:$0xff]  }
 0x14a   :  { %2369 = vmatprep.subr.bf16.mxu1 %v3958_v25  ;;  %2447 = vmatprep.subr.bf16.mxu0 %v3961_v26  ;;  %v4045_v25 = vld [vmem:[#allocation7 + $0x4c4] ss:$24 sps:$4 sm:$0xff]   ;;  %v4040_v26 = vld [vmem:[#allocation7 + $0x878] ss:$24 sps:$4 sm:$0xff]  }
 0x14d   :  { %2370 = vmatpush1.bf16.msra.mxu1 %v3956_v27  ;;  %2448 = vmatpush1.bf16.msra.mxu0 %v3959_v28  ;;  %v4043_v27 = vld [vmem:[#allocation7 + $0x4c0] ss:$24 sps:$4 sm:$0xff]   ;;  %v4048_v28 = vld [vmem:[#allocation7 + $0x8ac] ss:$24 sps:$4 sm:$0xff]  }
 0x14e   :  { %2382 = vmatprep.subr.bf16.mxu1 %v3964_v29  ;;  %2449 = vmatprep.subr.bf16.mxu0 %v3967_v30  ;;  %v4051_v29 = vld [vmem:[#allocation7 + $0x4f4] ss:$24 sps:$4 sm:$0xff]   ;;  %v4046_v30 = vld [vmem:[#allocation7 + $0x8a8] ss:$24 sps:$4 sm:$0xff]  }
 0x150   :  { %2372 = vmatmul.mubr.bf16.vlgmr.msra.gmra.mrb[0].mxu1 %v4524_v39  ;;  %v3988_v39 = vld [vmem:[#allocation7 + $0x6cc] ss:$24 sps:$4 sm:$0xff]  }
 0x151   :  { %2383 = vmatpush1.bf16.msra.mxu1 %v3962_v31  ;;  %2450 = vmatpush1.bf16.msra.mxu0 %v3965_v32  ;;  %v4049_v31 = vld [vmem:[#allocation7 + $0x4f0] ss:$24 sps:$4 sm:$0xff]   ;;  %v4054_v32 = vld [vmem:[#allocation7 + $0x8dc] ss:$24 sps:$4 sm:$0xff]  }
 0x152   :  { %2384 = vmatprep.subr.bf16.mxu1 %v3970_v33  ;;  %2451 = vmatprep.subr.bf16.mxu0 %v3973_v34  ;;  %v4057_v33 = vld [vmem:[#allocation7 + $0x524] ss:$24 sps:$4 sm:$0xff]   ;;  %v4052_v34 = vld [vmem:[#allocation7 + $0x8d8] ss:$24 sps:$4 sm:$0xff]  }
 0x153   :  { %2414 = vmatprep.mubr.bf16.mxu1 %v4527_v57  ;;  %v3997_v57 = vld [vmem:[#allocation7 + $0x344] ss:$24 sps:$4 sm:$0xff]  }
 0x155   :  { %2385 = vmatpush1.bf16.msra.mxu1 %v3968_v35  ;;  %2452 = vmatpush1.bf16.msra.mxu0 %v3971_v36  ;;  %v4055_v35 = vld [vmem:[#allocation7 + $0x520] ss:$24 sps:$4 sm:$0xff]   ;;  %v4060_v36 = vld [vmem:[#allocation7 + $0x554] ss:$24 sps:$4 sm:$0xff]  }
 0x156   :  { %2386 = vmatprep.subr.bf16.mxu1 %v3976_v37  ;;  %2453 = vmatprep.subr.bf16.mxu0 %v3979_v38  ;;  %v4118_v37 = vld [vmem:[#allocation11 + $0x40] sm:$0xff]  }
 0x157   :  { %v4058_v38 = vld [vmem:[#allocation7 + $0x550] ss:$24 sps:$4 sm:$0xff]  }
 0x159   :  { %2387 = vmatpush1.bf16.msra.mxu1 %v3974_v40  ;;  %2454 = vmatpush1.bf16.msra.mxu0 %v3977_v41  ;;  %v4119_v40 = vld [vmem:[#allocation11] sm:$0xff]  }
 0x15a   :  { %2388 = vmatprep.subr.bf16.mxu1 %v3982_v22  ;;  %2455 = vmatprep.subr.bf16.mxu0 %v3985_v42  ;;  %v4063_v41 = vld [vmem:[#allocation7 + $0x584] ss:$24 sps:$4 sm:$0xff]   ;;  %v4120_v22 = vld [vmem:[#allocation11 + $0x48] sm:$0xff]   ;;  %v4061_v42 = vld [vmem:[#allocation7 + $0x580] ss:$24 sps:$4 sm:$0xff]  }
 0x15d   :  { %2389 = vmatpush1.bf16.msra.mxu1 %v3980_v43  ;;  %2456 = vmatpush1.bf16.msra.mxu0 %v3983_v45  ;;  %v4121_v43 = vld [vmem:[#allocation11 + $0x8] sm:$0xff]  }
 0x15e   :  { %2390 = vmatprep.subr.bf16.mxu1 %v3988_v39  ;;  %2468 = vmatprep.subr.bf16.mxu0 %v3991_v10  ;;  %v4066_v45 = vld [vmem:[#allocation7 + $0x5b4] ss:$24 sps:$4 sm:$0xff]   ;;  %v4064_v10 = vld [vmem:[#allocation7 + $0x5b0] ss:$24 sps:$4 sm:$0xff]  }
 0x15f   :  { %v4122_v39 = vld [vmem:[#allocation11 + $0x50] sm:$0xff]  }
 0x160   :  { %2458 = vmatmul.mubr.bf16.vlgmr.msra.gmra.mrb[4].mxu0 %v4166_v49  ;;  %v4072_v49 = vld [vmem:[#allocation7 + $0x614] ss:$24 sps:$4 sm:$0xff]  }
 0x161   :  { %2391 = vmatpush1.bf16.msra.mxu1 %v3986_v46  ;;  %2469 = vmatpush1.bf16.msra.mxu0 %v3989_v47  ;;  %v4123_v46 = vld [vmem:[#allocation11 + $0x10] sm:$0xff]  }
 0x162   :  { %2392 = vmatprep.subr.bf16.mxu1 %v3994_v48  ;;  %2470 = vmatprep.subr.bf16.mxu0 %v3997_v57  ;;  %v4069_v47 = vld [vmem:[#allocation7 + $0x5e4] ss:$24 sps:$4 sm:$0xff]   ;;  %v4067_v57 = vld [vmem:[#allocation7 + $0x5e0] ss:$24 sps:$4 sm:$0xff]  }
 0x163   :  { %v4538_v54 = vpop.f32.mrb[0].mxu0  ;;  %2500 = vmatprep.mubr.bf16.mxu0 %v4167_v58  ;;  %v4124_v48 = vld [vmem:[#allocation11 + $0x58] sm:$0xff]  }
 0x164   :  { %v4540_v59 = vpop.f32.mrb[1].mxu0  ;;  %v4073_v58 = vld [vmem:[#allocation7 + $0x640] ss:$24 sps:$4 sm:$0xff]  }
 0x165   :  { %v4542_v61 = vpop.f32.mrb[2].mxu0  ;;  %2393 = vmatpush1.bf16.msra.mxu1 %v3992_v50  ;;  %2471 = vmatpush1.bf16.msra.mxu0 %v3995_v51  ;;  %v4126_v50 = vld [vmem:[#allocation11 + $0x60] sm:$0xff]  }
 0x166   :  { %v4544_v63 = vpop.f32.mrb[3].mxu0  ;;  %2394 = vmatprep.subr.bf16.mxu1 %v4000_v52  ;;  %2472 = vmatprep.subr.bf16.mxu0 %v4003_v53  ;;  %v4070_v51 = vld [vmem:[#allocation7 + $0x610] ss:$24 sps:$4 sm:$0xff]   ;;  %v4075_v52 = vld [vmem:[#allocation7 + $0x644] ss:$24 sps:$4 sm:$0xff]  }
 0x167   :  { %v4127_v53 = vld [vmem:[#allocation11 + $0x20] sm:$0xff]  }
 0x169   :  { %2395 = vmatpush1.bf16.msra.mxu1 %v3998_v55  ;;  %2473 = vmatpush1.bf16.msra.mxu0 %v4001_v56  ;;  %v4128_v55 = vld [vmem:[#allocation11 + $0x68] sm:$0xff]  }
 0x16a   :  { %2396 = vmatprep.subr.bf16.mxu1 %v4006_v60  ;;  %2474 = vmatprep.subr.bf16.mxu0 %v4009_v62  ;;  %v4168_v56 = vld [vmem:[#allocation2 + $0x8] ss:$24 sps:$4 sm:$0xff]   ;;  %v4169_v60 = vld [vmem:[#allocation2 + $0x14] ss:$24 sps:$4 sm:$0xff]  }
 0x16b   :  { %v4078_v62 = vld [vmem:[#allocation7 + $0x674] ss:$24 sps:$4 sm:$0xff]  }
 0x16d   :  { %2397 = vmatpush1.bf16.msra.mxu1 %v4004_v0  ;;  %2475 = vmatpush1.bf16.msra.mxu0 %v4007_v1  ;;  %v4129_v0 = vld [vmem:[#allocation11 + $0x28] sm:$0xff]  }
 0x16e   :  { %2398 = vmatprep.subr.bf16.mxu1 %v4012_v2  ;;  %2476 = vmatprep.subr.bf16.mxu0 %v4015_v3  ;;  %v4130_v2 = vld [vmem:[#allocation11 + $0x70] sm:$0xff]  }
 0x171   :  { %2399 = vmatpush1.bf16.msra.mxu1 %v4010_v4  ;;  %2477 = vmatpush1.bf16.msra.mxu0 %v4013_v5 }
 0x172   :  { %2400 = vmatprep.subr.bf16.mxu1 %v4018_v6  ;;  %2478 = vmatprep.subr.bf16.mxu0 %v4021_v7  ;;  %v4076_v7 = vld [vmem:[#allocation7 + $0x670] ss:$24 sps:$4 sm:$0xff]  }
 0x175   :  { %2401 = vmatpush1.bf16.msra.mxu1 %v4016_v8  ;;  %2479 = vmatpush1.bf16.msra.mxu0 %v4019_v9 }
 0x176   :  { %2402 = vmatprep.subr.bf16.mxu1 %v4024_v11  ;;  %2480 = vmatprep.subr.bf16.mxu0 %v4027_v12  ;;  %v4081_v11 = vld [vmem:[#allocation7 + $0x6a4] ss:$24 sps:$4 sm:$0xff]  }
 0x177   :  { %v4131_v12 = vld [vmem:[#allocation11 + $0x30] sm:$0xff]  }
 0x179   :  { %2403 = vmatpush1.bf16.msra.mxu1 %v4022_v13  ;;  %2481 = vmatpush1.bf16.msra.mxu0 %v4025_v14  ;;  %v4079_v14 = vld [vmem:[#allocation7 + $0x6a0] ss:$24 sps:$4 sm:$0xff]  }
 0x17a   :  { %2404 = vmatprep.subr.bf16.mxu1 %v4030_v15  ;;  %2482 = vmatprep.subr.bf16.mxu0 %v4033_v16  ;;  %v4133_v15 = vld [vmem:[#allocation11 + $0x38] sm:$0xff]   ;;  %v4134_v16 = vld [vmem:[#allocation11 + $0xc0] sm:$0xff]  }
 0x17d   :  { %2405 = vmatpush1.bf16.msra.mxu1 %v4028_v17  ;;  %2483 = vmatpush1.bf16.msra.mxu0 %v4031_v18  ;;  %v4087_v17 = vld [vmem:[#allocation7 + $0x704] ss:$24 sps:$4 sm:$0xff]   ;;  %v4085_v18 = vld [vmem:[#allocation7 + $0x700] ss:$24 sps:$4 sm:$0xff]  }
 0x17e   :  { %2406 = vmatprep.subr.bf16.mxu1 %v4036_v19  ;;  %2484 = vmatprep.subr.bf16.mxu0 %v4039_v20  ;;  %v4088_v19 = vld [vmem:[#allocation7 + $0x730] ss:$24 sps:$4 sm:$0xff]   ;;  %v4093_v20 = vld [vmem:[#allocation7 + $0x764] ss:$24 sps:$4 sm:$0xff]  }
 0x181   :  { %2407 = vmatpush1.bf16.msra.mxu1 %v4034_v21  ;;  %2485 = vmatpush1.bf16.msra.mxu0 %v4037_v23  ;;  %v4091_v21 = vld [vmem:[#allocation7 + $0x760] ss:$24 sps:$4 sm:$0xff]   ;;  %v4096_v23 = vld [vmem:[#allocation7 + $0x794] ss:$24 sps:$4 sm:$0xff]  }
 0x182   :  { %2408 = vmatprep.subr.bf16.mxu1 %v4042_v24  ;;  %2486 = vmatprep.subr.bf16.mxu0 %v4045_v25  ;;  %v4094_v24 = vld [vmem:[#allocation7 + $0x790] ss:$24 sps:$4 sm:$0xff]   ;;  %v4099_v25 = vld [vmem:[#allocation7 + $0x7c4] ss:$24 sps:$4 sm:$0xff]  }
 0x185   :  { %2409 = vmatpush1.bf16.msra.mxu1 %v4040_v26  ;;  %2487 = vmatpush1.bf16.msra.mxu0 %v4043_v27  ;;  %v4097_v26 = vld [vmem:[#allocation7 + $0x7c0] ss:$24 sps:$4 sm:$0xff]   ;;  %v4102_v27 = vld [vmem:[#allocation7 + $0x7f4] ss:$24 sps:$4 sm:$0xff]  }
 0x186   :  { %2410 = vmatprep.subr.bf16.mxu1 %v4048_v28  ;;  %2488 = vmatprep.subr.bf16.mxu0 %v4051_v29  ;;  %v4100_v28 = vld [vmem:[#allocation7 + $0x7f0] ss:$24 sps:$4 sm:$0xff]   ;;  %v4105_v29 = vld [vmem:[#allocation7 + $0x824] ss:$24 sps:$4 sm:$0xff]  }
 0x189   :  { %2411 = vmatpush1.bf16.msra.mxu1 %v4046_v30  ;;  %2489 = vmatpush1.bf16.msra.mxu0 %v4049_v31  ;;  %v4103_v30 = vld [vmem:[#allocation7 + $0x820] ss:$24 sps:$4 sm:$0xff]   ;;  %v4108_v31 = vld [vmem:[#allocation7 + $0x854] ss:$24 sps:$4 sm:$0xff]  }
 0x18a   :  { %2412 = vmatprep.subr.bf16.mxu1 %v4054_v32  ;;  %2490 = vmatprep.subr.bf16.mxu0 %v4057_v33  ;;  %v4106_v32 = vld [vmem:[#allocation7 + $0x850] ss:$24 sps:$4 sm:$0xff]   ;;  %v4111_v33 = vld [vmem:[#allocation7 + $0x884] ss:$24 sps:$4 sm:$0xff]  }
 0x18d   :  { %2413 = vmatpush1.bf16.msra.mxu1 %v4052_v34  ;;  %2491 = vmatpush1.bf16.msra.mxu0 %v4055_v35  ;;  %v4109_v34 = vld [vmem:[#allocation7 + $0x880] ss:$24 sps:$4 sm:$0xff]   ;;  %v4114_v35 = vld [vmem:[#allocation7 + $0x8b4] ss:$24 sps:$4 sm:$0xff]  }
 0x18e   :  { %2492 = vmatprep.subr.bf16.mxu0 %v4060_v36  ;;  %3523 = vmatprep.subr.bf16.mxu1 %v4118_v37  ;;  %v4112_v36 = vld [vmem:[#allocation7 + $0x8b0] ss:$24 sps:$4 sm:$0xff]   ;;  %v4117_v37 = vld [vmem:[#allocation7 + $0x8e4] ss:$24 sps:$4 sm:$0xff]  }
 0x190   :  { %2415 = vmatmul.mubr.bf16.vlgmr.msra.gmra.mrb[0].mxu1 %v4532_v44  ;;  %v4125_v44 = vld [vmem:[#allocation11 + $0x18] sm:$0xff]  }
 0x191   :  { %2493 = vmatpush1.bf16.msra.mxu0 %v4058_v38  ;;  %3524 = vmatpush3.bf16.msra.mxu1 %v4119_v40  ;;  %v4115_v38 = vld [vmem:[#allocation7 + $0x8e0] ss:$24 sps:$4 sm:$0xff]  }
 0x192   :  { %2494 = vmatprep.subr.bf16.mxu0 %v4063_v41  ;;  %3525 = vmatprep.subr.bf16.mxu1 %v4120_v22  ;;  %v4170_v40 = vld [vmem:[#allocation2 + $0x10] ss:$24 sps:$4 sm:$0xff]   ;;  %v2556_v41 = vlaneseq }
 0x194   :  { %v4559_v22 = vshrl.u32 %v2556_v41, 7  ;;  %v4156_v41 = vld [vmem:[#allocation11 + $0x158] sm:$0xff]  }
 0x195   :  { %2495 = vmatpush1.bf16.msra.mxu0 %v4061_v42  ;;  %3526 = vmatpush3.bf16.msra.mxu1 %v4121_v43  ;;  %v4562_v43 = vld [vmem:[#allocation10] sm:$0x3f] }
 0x196   :  { %2496 = vmatprep.subr.bf16.mxu0 %v4066_v45  ;;  %3527 = vmatprep.subr.bf16.mxu1 %v4122_v39  ;;  %v2558_v42 = vsub.s32 0, %v4559_v22  ;;  %v2562_v45 = vsub.s32 1, %v4559_v22 }
 0x198   :  { %v2559_v39 = vrot.slane %v4562_v43, %v2558_v42  ;;  %v4157_v42 = vld [vmem:[#allocation11 + $0x118] sm:$0xff]  }
 0x199   :  { %2497 = vmatpush1.bf16.msra.mxu0 %v4064_v10  ;;  %3528 = vmatpush3.bf16.msra.mxu1 %v4123_v46  ;;  %v2563_v46 = vrot.slane %v4562_v43, %v2562_v45  ;;  %v4158_v45 = vld [vmem:[#allocation11 + $0x160] sm:$0xff]  }
 0x19a   :  { %2498 = vmatprep.subr.bf16.mxu0 %v4069_v47  ;;  %3529 = vmatprep.subr.bf16.mxu1 %v4124_v48 }
 0x19d   :  { %2499 = vmatpush1.bf16.msra.mxu0 %v4067_v57  ;;  %3530 = vmatpush3.bf16.msra.mxu1 %v4125_v44 }
 0x19e   :  { %2511 = vmatprep.subr.bf16.mxu0 %v4072_v49  ;;  %3531 = vmatprep.subr.bf16.mxu1 %v4126_v50 }
 0x1a0   :  { %2501 = vmatmul.mubr.bf16.vlgmr.msra.gmra.mrb[4].mxu0 %v4168_v56 }
 0x1a1   :  { %2512 = vmatpush1.bf16.msra.mxu0 %v4070_v51  ;;  %2543 = vmatprep.mubr.bf16.mxu0 %v4169_v60 }
 0x1a2   :  { %2513 = vmatprep.subr.bf16.mxu0 %v4075_v52  ;;  %3532 = vmatpush3.bf16.msra.mxu1 %v4127_v53 }
 0x1a3   :  { %v2201_v1 = vpop.f32.mrb[4].mxu1  ;;  %3533 = vmatprep.subr.bf16.mxu1 %v4128_v55 }
 0x1a4   :  { %v4548_v3 = vadd.f32 %v2201_v1, %v4538_v54  ;;  %v2203_v4 = vpop.f32.mrb[5].mxu1  ;;  %v4132_v54 = vld [vmem:[#allocation11 + $0x78] sm:$0xff]  }
 0x1a5   :  { %v4551_v5 = vadd.f32 %v2203_v4, %v4540_v59  ;;  %v2205_v6 = vpop.f32.mrb[6].mxu1  ;;  %2514 = vmatpush1.bf16.msra.mxu0 %v4073_v58  ;;  %v4084_v59 = vld [vmem:[#allocation7 + $0x6d4] ss:$24 sps:$4 sm:$0xff]  }
 0x1a6   :  { %v4554_v8 = vadd.f32 %v2205_v6, %v4542_v61  ;;  %v2207_v9 = vpop.f32.mrb[7].mxu1  ;;  %2515 = vmatprep.subr.bf16.mxu0 %v4078_v62  ;;  %3534 = vmatpush3.bf16.msra.mxu1 %v4129_v0  ;;  %v4082_v61 = vld [vmem:[#allocation7 + $0x6d0] ss:$24 sps:$4 sm:$0xff]   ;;  %v4138_v6 = vld [vmem:[#allocation11 + $0xd0] sm:$0xff]  }
 0x1a7   :  { %v4557_v13 = vadd.f32 %v2207_v9, %v4544_v63  ;;  %3535 = vmatprep.subr.bf16.mxu1 %v4130_v2  ;;  %v4090_v63 = vld [vmem:[#allocation7 + $0x734] ss:$24 sps:$4 sm:$0xff]   ;;  %v4141_v9 = vld [vmem:[#allocation11 + $0x98] sm:$0xff]  }
 0x1a8   :  { %v4136_v4 = vld [vmem:[#allocation11 + $0xc8] sm:$0xff]  }
 0x1a9   :  { %2516 = vmatpush1.bf16.msra.mxu0 %v4076_v7  ;;  %v4139_v7 = vld [vmem:[#allocation11 + $0x90] sm:$0xff]  }
 0x1aa   :  { %2517 = vmatprep.subr.bf16.mxu0 %v4081_v11  ;;  %3536 = vmatpush3.bf16.msra.mxu1 %v4131_v12  ;;  %v4142_v11 = vld [vmem:[#allocation11 + $0xe0] sm:$0xff]  }
 0x1ab   :  { %3537 = vmatprep.subr.bf16.mxu1 %v4132_v54  ;;  %v4143_v12 = vld [vmem:[#allocation11 + $0xa0] sm:$0xff]   ;;  %v4145_v54 = vld [vmem:[#allocation11 + $0xa8] sm:$0xff]  }
 0x1ad   :  { %2518 = vmatpush1.bf16.msra.mxu0 %v4079_v14  ;;  %v4146_v14 = vld [vmem:[#allocation11 + $0xf0] sm:$0xff]  }
 0x1ae   :  { %2519 = vmatprep.subr.bf16.mxu0 %v4084_v59  ;;  %3538 = vmatpush3.bf16.msra.mxu1 %v4133_v15  ;;  %v4147_v59 = vld [vmem:[#allocation11 + $0xb0] sm:$0xff]   ;;  %v4148_v15 = vld [vmem:[#allocation11 + $0xf8] sm:$0xff]  }
 0x1af   :  { %3545 = vmatprep.subr.bf16.mxu1 %v4134_v16  ;;  %v4149_v16 = vld [vmem:[#allocation11 + $0xb8] sm:$0xff]  }
 0x1b1   :  { %2520 = vmatpush1.bf16.msra.mxu0 %v4082_v61  ;;  %v4150_v61 = vld [vmem:[#allocation11 + $0x140] sm:$0xff]  }
 0x1b2   :  { %2521 = vmatprep.subr.bf16.mxu0 %v4087_v17  ;;  %v2566_v17 = vsub.s32 2, %v4559_v22 }
 0x1b5   :  { %2522 = vmatpush1.bf16.msra.mxu0 %v4085_v18  ;;  %v2570_v18 = vsub.s32 3, %v4559_v22 }
 0x1b6   :  { %2523 = vmatprep.subr.bf16.mxu0 %v4090_v63  ;;  %v2567_v63 = vrot.slane %v4562_v43, %v2566_v17 }
 0x1b9   :  { %2524 = vmatpush1.bf16.msra.mxu0 %v4088_v19  ;;  %v2571_v19 = vrot.slane %v4562_v43, %v2570_v18 }
 0x1ba   :  { %2525 = vmatprep.subr.bf16.mxu0 %v4093_v20 }
 0x1bd   :  { %2526 = vmatpush1.bf16.msra.mxu0 %v4091_v21 }
 0x1be   :  { %2527 = vmatprep.subr.bf16.mxu0 %v4096_v23 }
 0x1c1   :  { %2528 = vmatpush1.bf16.msra.mxu0 %v4094_v24 }
 0x1c2   :  { %2529 = vmatprep.subr.bf16.mxu0 %v4099_v25 }
 0x1c5   :  { %2530 = vmatpush1.bf16.msra.mxu0 %v4097_v26 }
 0x1c6   :  { %2531 = vmatprep.subr.bf16.mxu0 %v4102_v27 }
 0x1c9   :  { %2532 = vmatpush1.bf16.msra.mxu0 %v4100_v28 }
 0x1ca   :  { %2533 = vmatprep.subr.bf16.mxu0 %v4105_v29 }
 0x1cd   :  { %2534 = vmatpush1.bf16.msra.mxu0 %v4103_v30 }
 0x1ce   :  { %2535 = vmatprep.subr.bf16.mxu0 %v4108_v31 }
 0x1d1   :  { %2536 = vmatpush1.bf16.msra.mxu0 %v4106_v32 }
 0x1d2   :  { %2537 = vmatprep.subr.bf16.mxu0 %v4111_v33 }
 0x1d5   :  { %2538 = vmatpush1.bf16.msra.mxu0 %v4109_v34 }
 0x1d6   :  { %2539 = vmatprep.subr.bf16.mxu0 %v4114_v35  ;;  %v4151_v35 = vld [vmem:[#allocation11 + $0x100] sm:$0xff]  }
 0x1d9   :  { %2540 = vmatpush1.bf16.msra.mxu0 %v4112_v36  ;;  %v4152_v36 = vld [vmem:[#allocation11 + $0x148] sm:$0xff]  }
 0x1da   :  { %2541 = vmatprep.subr.bf16.mxu0 %v4117_v37  ;;  %v4153_v37 = vld [vmem:[#allocation11 + $0x108] sm:$0xff]  }
 0x1dd   :  { %2542 = vmatpush1.bf16.msra.mxu0 %v4115_v38  ;;  %v4154_v38 = vld [vmem:[#allocation11 + $0x150] sm:$0xff]  }
 0x1e0   :  { %2544 = vmatmul.mubr.bf16.vlgmr.msra.gmra.mrb[4].mxu0 %v4170_v40  ;;  %v4155_v40 = vld [vmem:[#allocation11 + $0x110] sm:$0xff]  }
 0x1f3   :  { %v2287_v10 = vpop.f32.mrb[8].mxu0 }
 0x1f4   :  { %v3590_v47 = vadd.f32 %v2287_v10, %v4548_v3  ;;  %v2289_v48 = vpop.f32.mrb[9].mxu0  ;;  %v4135_v3 = vld [vmem:[#allocation11 + $0x80] sm:$0xff]   ;;  %v4160_v10 = vld [vmem:[#allocation11 + $0x168] sm:$0xff]  }
 0x1f5   :  { %v3592_v57 = vadd.f32 %v2289_v48, %v4551_v5  ;;  %v2291_v44 = vpop.f32.mrb[10].mxu0  ;;  %v4137_v5 = vld [vmem:[#allocation11 + $0x88] sm:$0xff]   ;;  %v4163_v48 = vld [vmem:[#allocation11 + $0x130] sm:$0xff]  }
 0x1f6   :  { %v2586_v49 = vadd.f32 %v3590_v47, %v2559_v39  ;;  %v3594_v50 = vadd.f32 %v2291_v44, %v4554_v8  ;;  %v2293_v51 = vpop.f32.mrb[11].mxu0  ;;  %v4140_v8 = vld [vmem:[#allocation11 + $0xd8] sm:$0xff]   ;;  %v4162_v47 = vld [vmem:[#allocation11 + $0x170] sm:$0xff]  }
 0x1f7   :  { %v2587_v52 = vadd.f32 %v3592_v57, %v2563_v46  ;;  %v3596_v53 = vadd.f32 %v2293_v51, %v4557_v13  ;;  %v4144_v13 = vld [vmem:[#allocation11 + $0xe8] sm:$0xff]   ;;  %v4164_v57 = vld [vmem:[#allocation11 + $0x178] sm:$0xff]  }
 0x1f8   :  { %v2592_v55 = vadd.f32 %v3594_v50, %v2559_v39  ;;  %v2598_v58 = vmax.f32 %v2586_v49, 0.0  ;;  %v4159_v39 = vld [vmem:[#allocation11 + $0x120] sm:$0xff]   ;;  %v4165_v44 = vld [vmem:[#allocation11 + $0x138] sm:$0xff]   ;;  %v2574_v49 = vsub.s32 4, %v4559_v22  ;;  %v2578_v50 = vsub.s32 5, %v4559_v22 }
 0x1f9   :  { %v2593_v56 = vadd.f32 %v3596_v53, %v2563_v46  ;;  %v2599_v62 = vmax.f32 %v2587_v52, 0.0  ;;  %v4161_v46 = vld [vmem:[#allocation11 + $0x128] sm:$0xff]  }
 0x1fa   :  { %v2604_v60 = vmax.f32 %v2592_v55, 0.0  ;;  %v2575_v51 = vrot.slane %v4562_v43, %v2574_v49  ;;  %v2579_v52 = vrot.slane %v4562_v43, %v2578_v50 }
 0x1fb   :  { %v2605_v0 = vmax.f32 %v2593_v56, 0.0 }
 0x1fc   :  { %v2610_v1 = vpack.c.bf16 %v2604_v60, %v2598_v58 }
 0x1fd   :  { %v2611_v2 = vpack.c.bf16 %v2605_v0, %v2599_v62 }
 0x1ff   :  { %3039 = vmatprep.mubr.bf16.mxu1 %v2611_v2 }
 0x200   :  { %3040 = vmatmul.mubr.bf16.vlgmr.msra.gmra.mrb[8].mxu1 %v2610_v1 }
 0x201   :  { %3546 = vmatpush3.bf16.msra.mxu1 %v4135_v3 }
 0x202   :  { %3547 = vmatprep.subr.bf16.mxu1 %v4136_v4 }
 0x205   :  { %3548 = vmatpush3.bf16.msra.mxu1 %v4137_v5 }
 0x206   :  { %3549 = vmatprep.subr.bf16.mxu1 %v4138_v6 }
 0x209   :  { %3550 = vmatpush3.bf16.msra.mxu1 %v4139_v7 }
 0x20a   :  { %3551 = vmatprep.subr.bf16.mxu1 %v4140_v8 }
 0x20d   :  { %3552 = vmatpush3.bf16.msra.mxu1 %v4141_v9 }
 0x20e   :  { %3553 = vmatprep.subr.bf16.mxu1 %v4142_v11 }
 0x211   :  { %3554 = vmatpush3.bf16.msra.mxu1 %v4143_v12 }
 0x212   :  { %3555 = vmatprep.subr.bf16.mxu1 %v4144_v13  ;;  %v3474_v13 = vld [vmem:[#allocation13] ss:$0 sm:$0xff] }
 0x215   :  { %3556 = vmatpush3.bf16.msra.mxu1 %v4145_v54 }
 0x216   :  { %3557 = vmatprep.subr.bf16.mxu1 %v4146_v14 }
 0x219   :  { %3558 = vmatpush3.bf16.msra.mxu1 %v4147_v59 }
 0x21a   :  { %3559 = vmatprep.subr.bf16.mxu1 %v4148_v15 }
 0x21d   :  { %3560 = vmatpush3.bf16.msra.mxu1 %v4149_v16 }
 0x21e   :  { %3567 = vmatprep.subr.bf16.mxu1 %v4150_v61 }
 0x263   :  { %v2416_v20 = vpop.f32.mrb[0].mxu1 }
 0x264   :  { %v2588_v21 = vadd.f32 %v2567_v63, %v2416_v20  ;;  %v2418_v23 = vpop.f32.mrb[1].mxu1 }
 0x265   :  { %v2589_v24 = vadd.f32 %v2571_v19, %v2418_v23  ;;  %v2420_v25 = vpop.f32.mrb[2].mxu1 }
 0x266   :  { %v2594_v26 = vadd.f32 %v2567_v63, %v2420_v25  ;;  %v2422_v27 = vpop.f32.mrb[3].mxu1  ;;  %v2600_v29 = vmax.f32 %v2588_v21, 0.0 }
 0x267   :  { %v2595_v28 = vadd.f32 %v2571_v19, %v2422_v27  ;;  %v2601_v31 = vmax.f32 %v2589_v24, 0.0 }
 0x268   :  { %v2606_v30 = vmax.f32 %v2594_v26, 0.0 }
 0x269   :  { %v2607_v32 = vmax.f32 %v2595_v28, 0.0 }
 0x26a   :  { %v2612_v33 = vpack.c.bf16 %v2606_v30, %v2600_v29 }
 0x26b   :  { %v2613_v34 = vpack.c.bf16 %v2607_v32, %v2601_v31 }
 0x26d   :  { %3080 = vmatprep.mubr.bf16.mxu1 %v2613_v34 }
 0x26e   :  { %3081 = vmatmul.mubr.bf16.vlgmr.msra.gmra.mrb[12].mxu1 %v2612_v33 }
 0x26f   :  { %3568 = vmatpush3.bf16.msra.mxu1 %v4151_v35 }
 0x270   :  { %3569 = vmatprep.subr.bf16.mxu1 %v4152_v36 }
 0x273   :  { %3570 = vmatpush3.bf16.msra.mxu1 %v4153_v37 }
 0x274   :  { %3571 = vmatprep.subr.bf16.mxu1 %v4154_v38 }
 0x277   :  { %3572 = vmatpush3.bf16.msra.mxu1 %v4155_v40 }
 0x278   :  { %3573 = vmatprep.subr.bf16.mxu1 %v4156_v41 }
 0x27b   :  { %3574 = vmatpush3.bf16.msra.mxu1 %v4157_v42 }
 0x27c   :  { %3575 = vmatprep.subr.bf16.mxu1 %v4158_v45 }
 0x27f   :  { %3576 = vmatpush3.bf16.msra.mxu1 %v4159_v39 }
 0x280   :  { %3577 = vmatprep.subr.bf16.mxu1 %v4160_v10 }
 0x283   :  { %3578 = vmatpush3.bf16.msra.mxu1 %v4161_v46 }
 0x284   :  { %3579 = vmatprep.subr.bf16.mxu1 %v4162_v47 }
 0x287   :  { %3580 = vmatpush3.bf16.msra.mxu1 %v4163_v48 }
 0x288   :  { %3581 = vmatprep.subr.bf16.mxu1 %v4164_v57 }
 0x28b   :  { %3582 = vmatpush3.bf16.msra.mxu1 %v4165_v44 }
 0x2b3   :  { %v2545_v53 = vpop.f32.mrb[4].mxu0 }
 0x2b4   :  { %v2590_v55 = vadd.f32 %v2575_v51, %v2545_v53  ;;  %v2547_v56 = vpop.f32.mrb[5].mxu0 }
 0x2b5   :  { %v2591_v58 = vadd.f32 %v2579_v52, %v2547_v56  ;;  %v2549_v60 = vpop.f32.mrb[6].mxu0 }
 0x2b6   :  { %v2596_v62 = vadd.f32 %v2575_v51, %v2549_v60  ;;  %v2551_v0 = vpop.f32.mrb[7].mxu0  ;;  %v2602_v2 = vmax.f32 %v2590_v55, 0.0 }
 0x2b7   :  { %v2597_v1 = vadd.f32 %v2579_v52, %v2551_v0  ;;  %v2603_v4 = vmax.f32 %v2591_v58, 0.0 }
 0x2b8   :  { %v2608_v3 = vmax.f32 %v2596_v62, 0.0 }
 0x2b9   :  { %v2609_v5 = vmax.f32 %v2597_v1, 0.0 }
 0x2ba   :  { %v2614_v6 = vpack.c.bf16 %v2608_v3, %v2602_v2 }
 0x2bb   :  { %v2615_v7 = vpack.c.bf16 %v2609_v5, %v2603_v4 }
 0x2bd   :  { %3121 = vmatprep.mubr.bf16.mxu1 %v2615_v7 }
 0x2be   :  { %3122 = vmatmul.mubr.bf16.vlgmr.msra.gmra.mrb[16].mxu1 %v2614_v6 }
 0x2d3   :  { %v3539_v22 = vpop.f32.mrb[8].mxu1 }
 0x2d4   :  { %v3540_v8 = vpop.f32.mrb[9].mxu1 }
 0x2d5   :  { %v3541_v9 = vadd.f32 %v3540_v8, %v3539_v22  ;;  %v3542_v43 = vpop.f32.mrb[10].mxu1 }
 0x2d6   :  { %v3543_v11 = vpop.f32.mrb[11].mxu1 }
 0x2d7   :  { %v3544_v12 = vadd.f32 %v3543_v11, %v3542_v43  ;;  %v3042_v59 = vadd.f32 %v3541_v9, %v3474_v13 }
 0x2d9   :  { %v3045_v17 = vadd.f32 %v3544_v12, %v3474_v13 }
 0x341   :  { %v3561_v54 = vpop.f32.mrb[12].mxu1 }
 0x342   :  { %v3562_v14 = vpop.f32.mrb[13].mxu1 }
 0x343   :  { %v3563_v15 = vadd.f32 %v3562_v14, %v3561_v54  ;;  %v3564_v16 = vpop.f32.mrb[14].mxu1 }
 0x344   :  { %v3565_v61 = vpop.f32.mrb[15].mxu1 }
 0x345   :  { %v3083_v18 = vadd.f32 %v3563_v15, %v3042_v59  ;;  %v3566_v63 = vadd.f32 %v3565_v61, %v3564_v16 }
 0x347   :  { %v3086_v19 = vadd.f32 %v3566_v63, %v3045_v17 }
 0x391   :  { %v3583_v20 = vpop.f32.mrb[16].mxu1 }
 0x392   :  { %v3584_v21 = vpop.f32.mrb[17].mxu1 }
 0x393   :  { %v3585_v23 = vadd.f32 %v3584_v21, %v3583_v20  ;;  %v3586_v24 = vpop.f32.mrb[18].mxu1 }
 0x394   :  { %v3587_v25 = vpop.f32.mrb[19].mxu1 }
 0x395   :  { %v3124_v26 = vadd.f32 %v3585_v23, %v3083_v18  ;;  %v3588_v27 = vadd.f32 %v3587_v25, %v3586_v24 }
 0x397   :  { %3130 = vst [vmem:[#allocation14] sm:$0xff] %v3124_v26  ;;  %v3127_v28 = vadd.f32 %v3588_v27, %v3086_v19 }
 0x399   :  { %3131 = vst [vmem:[#allocation14 + $0x8] sm:$0xff] %v3127_v28 }
 0x39a   :  { %4336 = shalt.err (!%p4333_p4)
}
 0x39b   :  { %s4337_s16 = scalar_lea.hbm %s4598_s7, 256 }
 0x39c   :  { %p4338_p5 = scmp.ne.s32.totalorder %s4598_s7, %s4337_s16  ;;  %p4341_p6 = scmp.lt.u32.totalorder %s4337_s16, %s4598_s7 }
 0x39e   :  { %p4343_p7 = pnand %p4341_p6, %p4338_p5 }
 0x3a0   :  { %4346 = shalt.err (!%p4343_p7)
}
 0x3a1   :  { %s4370_s24 = smov 128   ;;  %s4371_s26 = smov 8  }
 0x3a2   :  { %3143 = dma.vmem_to_hbm [thread:$0]  %s3138_s15, 256, %s4598_s7, [#allocation4], %s4370_s24, %s4370_s24, %s4371_s26  }
 0x3a3   :  { %4355 = dma.done.wait [#allocation4], 256  }
 0x3a4   :  { %4356 = vsyncadd [#allocation4], 4294967040 }
 0x3a5   :  { %3147 = vsyncpa [#allocation3], 1 }
 0x3a6   :  { %3148 = vsyncpa [#allocation6], 1 }
 0x3a7   :  { %3149 = vsyncpa [#allocation9], 1 }
 0x3a8   :  { %3150 = vsyncpa [#allocation12], 1 }
 0x3a9   :  { %3151 = vsyncpa [#allocation4], 1 }

</bundles_post_ra>
